<compile_context>
chip_gen: v7x
topology: tpu7x:2x2x1
jax: 0.10.0
libtpu: 0.0.40
codegen_flags: <defaults>
</compile_context>

<pallas_src>
import functools

import jax
import jax.numpy as jnp
import numpy as np
from jax.experimental import pallas as pl
from jax.experimental.pallas import tpu as pltpu

KSIZE = 7
PAD = 3  # kernel_size == 7 -> padding = 3


def spatial_attention_kernel(w_ref, x_ref, o_ref, csum_ref, cmax_ref,
                             *, C, C_pad, Cb, H, W):
    # w_ref    : SMEM (2*7*7,) f32 conv weights, OIHW-flattened (O=1).
    # x_ref    : VMEM (Nb, Cb, L) input tile, lane axis = H*W.
    # o_ref    : VMEM (Nb, L) output tile (written at the last channel step).
    # csum_ref : VMEM (Nb, L) f32 running channel sum.
    # cmax_ref : VMEM (Nb, L) f32 running channel max.
    k = pl.program_id(1)
    nk = pl.num_programs(1)
    Nb = o_ref.shape[0]
    L = H * W

    @pl.when(k == 0)
    def _init():
        csum_ref[...] = jnp.zeros(csum_ref.shape, csum_ref.dtype)
        cmax_ref[...] = jnp.full(cmax_ref.shape, -jnp.inf, cmax_ref.dtype)

    # --- Streaming channel reduction: sublane-axis sum/max over the tile ----
    x_t = x_ref[...]                                        # (Nb, Cb, L)
    if C_pad != C:
        # Zero-padded channels must not pollute the max (sum is unaffected).
        ch = k * Cb + jax.lax.broadcasted_iota(jnp.int32, x_t.shape, 1)
        x_max_src = jnp.where(ch < C, x_t, jnp.array(-jnp.inf, x_t.dtype))
    else:
        x_max_src = x_t
    csum_ref[...] += jnp.sum(x_t.astype(jnp.float32), axis=1)
    cmax_ref[...] = jnp.maximum(
        cmax_ref[...], jnp.max(x_max_src, axis=1).astype(jnp.float32))

    # --- Last channel step: factored 7x7 conv (2 -> 1 ch) + sigmoid ---------
    @pl.when(k == nk - 1)
    def _finalize():
        maps = (csum_ref[...] * (1.0 / C), cmax_ref[...])   # (avg, max), (Nb, L)

        lane = jax.lax.broadcasted_iota(jnp.int32, (Nb, L), 1)
        col = lane % W                                      # column index j

        def shift_flat(v, s):
            # u[:, p] = v[:, p + s] for 0 <= p + s < L, else 0 (static s).
            if s == 0:
                return v
            if abs(s) >= L:
                return jnp.zeros_like(v)
            r = pltpu.roll(v, (-s) % L, axis=1)             # XLU lane rotate
            if s > 0:
                return jnp.where(lane < L - s, r, 0.0)
            return jnp.where(lane >= -s, r, 0.0)

        # Row offsets (kh): flat lane shifts by multiples of W exactly
        # reproduce the top/bottom zero padding; accumulate per-kw partials.
        partials = [None] * KSIZE
        for ci in range(2):
            for kh in range(KSIZE):
                shifted = shift_flat(maps[ci], (kh - PAD) * W)
                for kw in range(KSIZE):
                    wgt = w_ref[ci * KSIZE * KSIZE + kh * KSIZE + kw]
                    term = wgt * shifted
                    partials[kw] = term if partials[kw] is None else partials[kw] + term

        # Column offsets (kw): one roll + one column-validity mask per tap.
        acc = jnp.zeros((Nb, L), jnp.float32)
        for kw in range(KSIZE):
            dw = kw - PAD
            p = partials[kw]
            if dw != 0:
                r = pltpu.roll(p, (-dw) % L, axis=1)
                if dw > 0:
                    p = jnp.where(col < W - dw, r, 0.0)
                else:
                    p = jnp.where(col >= -dw, r, 0.0)
            acc = acc + p

        o_ref[...] = jax.nn.sigmoid(acc).astype(o_ref.dtype)


def _round_up(x, m):
    return -(-x // m) * m


def _choose_blocks(N, C, L, itemsize, target_bytes):
    """Pick (Nb, N_pad, Cb, C_pad) targeting ~target_bytes per input tile."""
    sub = 8 if itemsize >= 4 else 16          # sublane quantum (f32 / bf16)
    # Grow the batch block while the full-C slab still fits the target, >= 2
    # parallel batch blocks remain (keeps both v7x TensorCores busy) and the
    # (Nb, L) f32 conv working arrays stay register-friendly (~16 vregs).
    nb = sub
    nb_cap = max(sub, ((64 * 1024) // max(1, L * 4)) // sub * sub)
    while (nb * 2 <= nb_cap
           and 2 * nb * C * L * itemsize <= target_bytes
           and _round_up(N, 2 * nb) // (2 * nb) >= 2):
        nb *= 2
    n_pad = _round_up(N, nb)
    # Channel block: as many channels per grid step as fit the per-tile budget.
    cb = max(1, target_bytes // (nb * L * itemsize))
    if cb >= C:
        cb = C
    else:
        cb = min(C, max(sub, cb // sub * sub))  # tile-aligned when tiling C
    c_pad = _round_up(C, cb)
    return nb, n_pad, cb, c_pad


def spatial_attention(x, conv_weight, *, target_block_bytes=12 * 1024 * 1024):
    """x: (N, C, H, W); conv_weight: (1, 2, 7, 7). Returns (N, 1, H, W)."""
    N, C, H, W = x.shape
    L = H * W
    itemsize = x.dtype.itemsize

    # TODO(synk): per-generation tuning (v5e/v6e tolerate 16-32 MiB tiles with
    # vmem_limit raised toward 96 MiB; v7x should stay <= ~16 MiB) and row-band
    # (halo) processing of the conv for very large H*W working sets.
    Nb, N_pad, Cb, C_pad = _choose_blocks(N, C, L, itemsize, target_block_bytes)

    x_flat = x.reshape(N, C, L)                            # lane axis = H*W
    if (N_pad, C_pad) != (N, C):
        x_flat = jnp.pad(x_flat, ((0, N_pad - N), (0, C_pad - C), (0, 0)))
    w_flat = conv_weight.reshape(-1).astype(jnp.float32)   # (2*7*7,)

    grid = (N_pad // Nb, C_pad // Cb)
    kernel = functools.partial(spatial_attention_kernel,
                               C=C, C_pad=C_pad, Cb=Cb, H=H, W=W)

    out_flat = pl.pallas_call(
        kernel,
        out_shape=jax.ShapeDtypeStruct((N_pad, L), x.dtype),
        grid_spec=pltpu.PrefetchScalarGridSpec(
            num_scalar_prefetch=0,
            grid=grid,
            in_specs=[
                pl.BlockSpec(memory_space=pltpu.SMEM),              # conv weights
                pl.BlockSpec((Nb, Cb, L), lambda n, k: (n, k, 0)),  # x tile
            ],
            out_specs=pl.BlockSpec((Nb, L), lambda n, k: (n, 0)),
            scratch_shapes=[
                pltpu.VMEM((Nb, L), jnp.float32),   # running channel sum
                pltpu.VMEM((Nb, L), jnp.float32),   # running channel max
            ],
        ),
        compiler_params=pltpu.CompilerParams(
            dimension_semantics=("parallel", "arbitrary"),
            vmem_limit_bytes=48 * 1024 * 1024,
        ),
    )(w_flat, x_flat)

    return out_flat[:N].reshape(N, 1, H, W)


def spatial_attention_reference(x, conv_weight):
    """Plain-JAX reference matching the PyTorch forward exactly."""
    avg_out = jnp.mean(x, axis=1, keepdims=True)
    max_out = jnp.max(x, axis=1, keepdims=True)
    feats = jnp.concatenate([avg_out, max_out], axis=1)     # (N, 2, H, W)
    y = jax.lax.conv_general_dilated(
        feats, conv_weight,
        window_strides=(1, 1), padding=((PAD, PAD), (PAD, PAD)),
        dimension_numbers=("NCHW", "OIHW", "NCHW"),
    )
    return jax.nn.sigmoid(y)


if __name__ == "__main__":
    key = jax.random.PRNGKey(0)
    k_x, k_w = jax.random.split(key)

    N, C, H, W = 2, 4, 16, 16
    x = jax.random.normal(k_x, (N, C, H, W), dtype=jnp.float32)
    # Deterministic synthetic weights for conv1: (out=1, in=2, 7, 7), no bias.
    conv_weight = 0.1 * jax.random.normal(k_w, (1, 2, KSIZE, KSIZE), dtype=jnp.float32)

    out = jax.block_until_ready(spatial_attention(x, conv_weight))
    ref = jax.block_until_ready(spatial_attention_reference(x, conv_weight))
    np.testing.assert_allclose(np.asarray(out), np.asarray(ref), rtol=1e-5, atol=1e-5)

    print("KERNEL_OK")
</pallas_src>

<mosaic_0001>
module attributes {stable_mosaic.version = 11 : i64} {
  func.func @spatial_attention_kernel(%arg0: i32, %arg1: i32, %arg2: memref<98xf32, #tpu.memory_space<smem>>, %arg3: memref<8x4x256xf32, #tpu.memory_space<vmem>>, %arg4: memref<8x256xf32, #tpu.memory_space<vmem>>, %arg5: memref<8x256xf32, #tpu.memory_space<vmem>>, %arg6: memref<8x256xf32, #tpu.memory_space<vmem>>) attributes {dimension_semantics = [#tpu.dimension_semantics<parallel>, #tpu.dimension_semantics<arbitrary>], iteration_bounds = array<i64: 1, 1>, scalar_prefetch = 0 : i64, scratch_operands = 2 : i64, tpu.core_type = #tpu.core_type<tc>, window_params = [{transform_indices = @transform_0, window_bounds = array<i64: 98>}, {transform_indices = @transform_1, window_bounds = array<i64: 8, 4, 256>}, {transform_indices = @transform_2, window_bounds = array<i64: 8, 256>}]} {
    %c0_i32 = arith.constant 0 : i32
    %0 = arith.cmpi eq, %arg1, %c0_i32 : i32
    %1 = arith.extui %0 : i1 to i32
    %c0_i32_0 = arith.constant 0 : i32
    %2 = arith.cmpi ne, %1, %c0_i32_0 : i32
    scf.if %2 {
      %cst_14 = arith.constant 0.000000e+00 : f32
      %15 = vector.broadcast %cst_14 : f32 to vector<8x256xf32>
      %c0_15 = arith.constant 0 : index
      %c0_16 = arith.constant 0 : index
      %16 = vector.load %arg5[%c0_15, %c0_16] : memref<8x256xf32, #tpu.memory_space<vmem>>, vector<8x256xf32>
      tpu.vector_store %arg5[%c0_15, %c0_16], %15 {strides = array<i32>} : memref<8x256xf32, #tpu.memory_space<vmem>>, vector<8x256xf32>,
      %cst_17 = arith.constant 0xFF800000 : f32
      %17 = vector.broadcast %cst_17 : f32 to vector<8x256xf32>
      %c0_18 = arith.constant 0 : index
      %c0_19 = arith.constant 0 : index
      %18 = vector.load %arg6[%c0_18, %c0_19] : memref<8x256xf32, #tpu.memory_space<vmem>>, vector<8x256xf32>
      tpu.vector_store %arg6[%c0_18, %c0_19], %17 {strides = array<i32>} : memref<8x256xf32, #tpu.memory_space<vmem>>, vector<8x256xf32>,
    } else {
    }
    %c0 = arith.constant 0 : index
    %c0_1 = arith.constant 0 : index
    %c0_2 = arith.constant 0 : index
    %3 = vector.load %arg3[%c0, %c0_1, %c0_2] : memref<8x4x256xf32, #tpu.memory_space<vmem>>, vector<8x4x256xf32>
    %c0_3 = arith.constant 0 : index
    %c0_4 = arith.constant 0 : index
    %4 = vector.load %arg5[%c0_3, %c0_4] : memref<8x256xf32, #tpu.memory_space<vmem>>, vector<8x256xf32>
    %cst = arith.constant dense<0.000000e+00> : vector<8x256xf32>
    %5 = vector.multi_reduction <add>, %3, %cst [1] : vector<8x4x256xf32> to vector<8x256xf32>
    %6 = arith.addf %4, %5 : vector<8x256xf32>
    %c0_5 = arith.constant 0 : index
    %c0_6 = arith.constant 0 : index
    %7 = vector.load %arg5[%c0_5, %c0_6] : memref<8x256xf32, #tpu.memory_space<vmem>>, vector<8x256xf32>
    tpu.vector_store %arg5[%c0_5, %c0_6], %6 {strides = array<i32>} : memref<8x256xf32, #tpu.memory_space<vmem>>, vector<8x256xf32>,
    %c0_7 = arith.constant 0 : index
    %c0_8 = arith.constant 0 : index
    %8 = vector.load %arg6[%c0_7, %c0_8] : memref<8x256xf32, #tpu.memory_space<vmem>>, vector<8x256xf32>
    %cst_9 = arith.constant dense<0xFF800000> : vector<8x256xf32>
    %9 = vector.multi_reduction <maximumf>, %3, %cst_9 [1] : vector<8x4x256xf32> to vector<8x256xf32>
    %10 = arith.maximumf %8, %9 : vector<8x256xf32>
    %c0_10 = arith.constant 0 : index
    %c0_11 = arith.constant 0 : index
    %11 = vector.load %arg6[%c0_10, %c0_11] : memref<8x256xf32, #tpu.memory_space<vmem>>, vector<8x256xf32>
    tpu.vector_store %arg6[%c0_10, %c0_11], %10 {strides = array<i32>} : memref<8x256xf32, #tpu.memory_space<vmem>>, vector<8x256xf32>,
    %c0_i32_12 = arith.constant 0 : i32
    %12 = arith.cmpi eq, %arg1, %c0_i32_12 : i32
    %13 = arith.extui %12 : i1 to i32
    %c0_i32_13 = arith.constant 0 : i32
    %14 = arith.cmpi ne, %13, %c0_i32_13 : i32
    scf.if %14 {
      %c0_14 = arith.constant 0 : index
      %c0_15 = arith.constant 0 : index
      %15 = vector.load %arg5[%c0_14, %c0_15] : memref<8x256xf32, #tpu.memory_space<vmem>>, vector<8x256xf32>
      %cst_16 = arith.constant 2.500000e-01 : f32
      %16 = vector.broadcast %cst_16 : f32 to vector<8x256xf32>
      %17 = arith.mulf %15, %16 : vector<8x256xf32>
      %c0_17 = arith.constant 0 : index
      %c0_18 = arith.constant 0 : index
      %18 = vector.load %arg6[%c0_17, %c0_18] : memref<8x256xf32, #tpu.memory_space<vmem>>, vector<8x256xf32>
      %19 = tpu.iota {dimensions = array<i32: 1>} : vector<8x256xi32>
      %c16_i32 = arith.constant 16 : i32
      %c0_i32_19 = arith.constant 0 : i32
      %20 = arith.cmpi eq, %c16_i32, %c0_i32_19 : i32
      %c1_i32 = arith.constant 1 : i32
      %21 = arith.select %20, %c1_i32, %c16_i32 : i32
      %22 = vector.broadcast %21 : i32 to vector<8x256xi32>
      %23 = arith.remsi %19, %22 : vector<8x256xi32>
      %c0_i32_20 = arith.constant 0 : i32
      %24 = vector.broadcast %c0_i32_20 : i32 to vector<8x256xi32>
      %25 = arith.cmpi ne, %23, %24 : vector<8x256xi32>
      %c0_i32_21 = arith.constant 0 : i32
      %26 = vector.broadcast %c0_i32_21 : i32 to vector<8x256xi32>
      %27 = arith.cmpi slt, %23, %26 : vector<8x256xi32>
      %c0_i32_22 = arith.constant 0 : i32
      %28 = arith.cmpi slt, %21, %c0_i32_22 : i32
      %29 = vector.broadcast %28 : i1 to vector<8x256xi1>
      %30 = vector.broadcast %29 : vector<8x256xi1> to vector<8x256xi1>
      %31 = arith.xori %27, %30 : vector<8x256xi1>
      %32 = arith.andi %31, %25 : vector<8x256xi1>
      %33 = vector.broadcast %21 : i32 to vector<8x256xi32>
      %34 = arith.addi %23, %33 : vector<8x256xi32>
      %35 = arith.select %32, %34, %23 : vector<8x256xi1>, vector<8x256xi32>
      %c48_i32 = arith.constant 48 : i32
      %36 = tpu.dynamic_rotate %17 by %c48_i32 dim 1 : vector<8x256xf32>, i32 -> vector<8x256xf32>
      %c48_i32_23 = arith.constant 48 : i32
      %37 = vector.broadcast %c48_i32_23 : i32 to vector<8x256xi32>
      %38 = arith.cmpi sge, %19, %37 : vector<8x256xi32>
      %cst_24 = arith.constant 0.000000e+00 : f32
      %39 = vector.broadcast %cst_24 : f32 to vector<8x256xf32>
      %40 = arith.select %38, %36, %39 : vector<8x256xi1>, vector<8x256xf32>
      %c0_25 = arith.constant 0 : index
      %41 = memref.load %arg2[%c0_25] : memref<98xf32, #tpu.memory_space<smem>>
      %42 = vector.broadcast %41 : f32 to vector<8x256xf32>
      %43 = arith.mulf %42, %40 : vector<8x256xf32>
      %c1 = arith.constant 1 : index
      %44 = memref.load %arg2[%c1] : memref<98xf32, #tpu.memory_space<smem>>
      %45 = vector.broadcast %44 : f32 to vector<8x256xf32>
      %46 = arith.mulf %45, %40 : vector<8x256xf32>
      %c2 = arith.constant 2 : index
      %47 = memref.load %arg2[%c2] : memref<98xf32, #tpu.memory_space<smem>>
      %48 = vector.broadcast %47 : f32 to vector<8x256xf32>
      %49 = arith.mulf %48, %40 : vector<8x256xf32>
      %c3 = arith.constant 3 : index
      %50 = memref.load %arg2[%c3] : memref<98xf32, #tpu.memory_space<smem>>
      %51 = vector.broadcast %50 : f32 to vector<8x256xf32>
      %52 = arith.mulf %51, %40 : vector<8x256xf32>
      %c4 = arith.constant 4 : index
      %53 = memref.load %arg2[%c4] : memref<98xf32, #tpu.memory_space<smem>>
      %54 = vector.broadcast %53 : f32 to vector<8x256xf32>
      %55 = arith.mulf %54, %40 : vector<8x256xf32>
      %c5 = arith.constant 5 : index
      %56 = memref.load %arg2[%c5] : memref<98xf32, #tpu.memory_space<smem>>
      %57 = vector.broadcast %56 : f32 to vector<8x256xf32>
      %58 = arith.mulf %57, %40 : vector<8x256xf32>
      %c6 = arith.constant 6 : index
      %59 = memref.load %arg2[%c6] : memref<98xf32, #tpu.memory_space<smem>>
      %60 = vector.broadcast %59 : f32 to vector<8x256xf32>
      %61 = arith.mulf %60, %40 : vector<8x256xf32>
      %c32_i32 = arith.constant 32 : i32
      %62 = tpu.dynamic_rotate %17 by %c32_i32 dim 1 : vector<8x256xf32>, i32 -> vector<8x256xf32>
      %c32_i32_26 = arith.constant 32 : i32
      %63 = vector.broadcast %c32_i32_26 : i32 to vector<8x256xi32>
      %64 = arith.cmpi sge, %19, %63 : vector<8x256xi32>
      %cst_27 = arith.constant 0.000000e+00 : f32
      %65 = vector.broadcast %cst_27 : f32 to vector<8x256xf32>
      %66 = arith.select %64, %62, %65 : vector<8x256xi1>, vector<8x256xf32>
      %c7 = arith.constant 7 : index
      %67 = memref.load %arg2[%c7] : memref<98xf32, #tpu.memory_space<smem>>
      %68 = vector.broadcast %67 : f32 to vector<8x256xf32>
      %69 = arith.mulf %68, %66 : vector<8x256xf32>
      %70 = arith.addf %43, %69 : vector<8x256xf32>
      %c8 = arith.constant 8 : index
      %71 = memref.load %arg2[%c8] : memref<98xf32, #tpu.memory_space<smem>>
      %72 = vector.broadcast %71 : f32 to vector<8x256xf32>
      %73 = arith.mulf %72, %66 : vector<8x256xf32>
      %74 = arith.addf %46, %73 : vector<8x256xf32>
      %c9 = arith.constant 9 : index
      %75 = memref.load %arg2[%c9] : memref<98xf32, #tpu.memory_space<smem>>
      %76 = vector.broadcast %75 : f32 to vector<8x256xf32>
      %77 = arith.mulf %76, %66 : vector<8x256xf32>
      %78 = arith.addf %49, %77 : vector<8x256xf32>
      %c10 = arith.constant 10 : index
      %79 = memref.load %arg2[%c10] : memref<98xf32, #tpu.memory_space<smem>>
      %80 = vector.broadcast %79 : f32 to vector<8x256xf32>
      %81 = arith.mulf %80, %66 : vector<8x256xf32>
      %82 = arith.addf %52, %81 : vector<8x256xf32>
      %c11 = arith.constant 11 : index
      %83 = memref.load %arg2[%c11] : memref<98xf32, #tpu.memory_space<smem>>
      %84 = vector.broadcast %83 : f32 to vector<8x256xf32>
      %85 = arith.mulf %84, %66 : vector<8x256xf32>
      %86 = arith.addf %55, %85 : vector<8x256xf32>
      %c12 = arith.constant 12 : index
      %87 = memref.load %arg2[%c12] : memref<98xf32, #tpu.memory_space<smem>>
      %88 = vector.broadcast %87 : f32 to vector<8x256xf32>
      %89 = arith.mulf %88, %66 : vector<8x256xf32>
      %90 = arith.addf %58, %89 : vector<8x256xf32>
      %c13 = arith.constant 13 : index
      %91 = memref.load %arg2[%c13] : memref<98xf32, #tpu.memory_space<smem>>
      %92 = vector.broadcast %91 : f32 to vector<8x256xf32>
      %93 = arith.mulf %92, %66 : vector<8x256xf32>
      %94 = arith.addf %61, %93 : vector<8x256xf32>
      %c16_i32_28 = arith.constant 16 : i32
      %95 = tpu.dynamic_rotate %17 by %c16_i32_28 dim 1 : vector<8x256xf32>, i32 -> vector<8x256xf32>
      %c16_i32_29 = arith.constant 16 : i32
      %96 = vector.broadcast %c16_i32_29 : i32 to vector<8x256xi32>
      %97 = arith.cmpi sge, %19, %96 : vector<8x256xi32>
      %cst_30 = arith.constant 0.000000e+00 : f32
      %98 = vector.broadcast %cst_30 : f32 to vector<8x256xf32>
      %99 = arith.select %97, %95, %98 : vector<8x256xi1>, vector<8x256xf32>
      %c14 = arith.constant 14 : index
      %100 = memref.load %arg2[%c14] : memref<98xf32, #tpu.memory_space<smem>>
      %101 = vector.broadcast %100 : f32 to vector<8x256xf32>
      %102 = arith.mulf %101, %99 : vector<8x256xf32>
      %103 = arith.addf %70, %102 : vector<8x256xf32>
      %c15 = arith.constant 15 : index
      %104 = memref.load %arg2[%c15] : memref<98xf32, #tpu.memory_space<smem>>
      %105 = vector.broadcast %104 : f32 to vector<8x256xf32>
      %106 = arith.mulf %105, %99 : vector<8x256xf32>
      %107 = arith.addf %74, %106 : vector<8x256xf32>
      %c16 = arith.constant 16 : index
      %108 = memref.load %arg2[%c16] : memref<98xf32, #tpu.memory_space<smem>>
      %109 = vector.broadcast %108 : f32 to vector<8x256xf32>
      %110 = arith.mulf %109, %99 : vector<8x256xf32>
      %111 = arith.addf %78, %110 : vector<8x256xf32>
      %c17 = arith.constant 17 : index
      %112 = memref.load %arg2[%c17] : memref<98xf32, #tpu.memory_space<smem>>
      %113 = vector.broadcast %112 : f32 to vector<8x256xf32>
      %114 = arith.mulf %113, %99 : vector<8x256xf32>
      %115 = arith.addf %82, %114 : vector<8x256xf32>
      %c18 = arith.constant 18 : index
      %116 = memref.load %arg2[%c18] : memref<98xf32, #tpu.memory_space<smem>>
      %117 = vector.broadcast %116 : f32 to vector<8x256xf32>
      %118 = arith.mulf %117, %99 : vector<8x256xf32>
      %119 = arith.addf %86, %118 : vector<8x256xf32>
      %c19 = arith.constant 19 : index
      %120 = memref.load %arg2[%c19] : memref<98xf32, #tpu.memory_space<smem>>
      %121 = vector.broadcast %120 : f32 to vector<8x256xf32>
      %122 = arith.mulf %121, %99 : vector<8x256xf32>
      %123 = arith.addf %90, %122 : vector<8x256xf32>
      %c20 = arith.constant 20 : index
      %124 = memref.load %arg2[%c20] : memref<98xf32, #tpu.memory_space<smem>>
      %125 = vector.broadcast %124 : f32 to vector<8x256xf32>
      %126 = arith.mulf %125, %99 : vector<8x256xf32>
      %127 = arith.addf %94, %126 : vector<8x256xf32>
      %c21 = arith.constant 21 : index
      %128 = memref.load %arg2[%c21] : memref<98xf32, #tpu.memory_space<smem>>
      %129 = vector.broadcast %128 : f32 to vector<8x256xf32>
      %130 = arith.mulf %129, %17 : vector<8x256xf32>
      %131 = arith.addf %103, %130 : vector<8x256xf32>
      %c22 = arith.constant 22 : index
      %132 = memref.load %arg2[%c22] : memref<98xf32, #tpu.memory_space<smem>>
      %133 = vector.broadcast %132 : f32 to vector<8x256xf32>
      %134 = arith.mulf %133, %17 : vector<8x256xf32>
      %135 = arith.addf %107, %134 : vector<8x256xf32>
      %c23 = arith.constant 23 : index
      %136 = memref.load %arg2[%c23] : memref<98xf32, #tpu.memory_space<smem>>
      %137 = vector.broadcast %136 : f32 to vector<8x256xf32>
      %138 = arith.mulf %137, %17 : vector<8x256xf32>
      %139 = arith.addf %111, %138 : vector<8x256xf32>
      %c24 = arith.constant 24 : index
      %140 = memref.load %arg2[%c24] : memref<98xf32, #tpu.memory_space<smem>>
      %141 = vector.broadcast %140 : f32 to vector<8x256xf32>
      %142 = arith.mulf %141, %17 : vector<8x256xf32>
      %143 = arith.addf %115, %142 : vector<8x256xf32>
      %c25 = arith.constant 25 : index
      %144 = memref.load %arg2[%c25] : memref<98xf32, #tpu.memory_space<smem>>
      %145 = vector.broadcast %144 : f32 to vector<8x256xf32>
      %146 = arith.mulf %145, %17 : vector<8x256xf32>
      %147 = arith.addf %119, %146 : vector<8x256xf32>
      %c26 = arith.constant 26 : index
      %148 = memref.load %arg2[%c26] : memref<98xf32, #tpu.memory_space<smem>>
      %149 = vector.broadcast %148 : f32 to vector<8x256xf32>
      %150 = arith.mulf %149, %17 : vector<8x256xf32>
      %151 = arith.addf %123, %150 : vector<8x256xf32>
      %c27 = arith.constant 27 : index
      %152 = memref.load %arg2[%c27] : memref<98xf32, #tpu.memory_space<smem>>
      %153 = vector.broadcast %152 : f32 to vector<8x256xf32>
      %154 = arith.mulf %153, %17 : vector<8x256xf32>
      %155 = arith.addf %127, %154 : vector<8x256xf32>
      %c240_i32 = arith.constant 240 : i32
      %156 = tpu.dynamic_rotate %17 by %c240_i32 dim 1 : vector<8x256xf32>, i32 -> vector<8x256xf32>
      %c240_i32_31 = arith.constant 240 : i32
      %157 = vector.broadcast %c240_i32_31 : i32 to vector<8x256xi32>
      %158 = arith.cmpi slt, %19, %157 : vector<8x256xi32>
      %cst_32 = arith.constant 0.000000e+00 : f32
      %159 = vector.broadcast %cst_32 : f32 to vector<8x256xf32>
      %160 = arith.select %158, %156, %159 : vector<8x256xi1>, vector<8x256xf32>
      %c28 = arith.constant 28 : index
      %161 = memref.load %arg2[%c28] : memref<98xf32, #tpu.memory_space<smem>>
      %162 = vector.broadcast %161 : f32 to vector<8x256xf32>
      %163 = arith.mulf %162, %160 : vector<8x256xf32>
      %164 = arith.addf %131, %163 : vector<8x256xf32>
      %c29 = arith.constant 29 : index
      %165 = memref.load %arg2[%c29] : memref<98xf32, #tpu.memory_space<smem>>
      %166 = vector.broadcast %165 : f32 to vector<8x256xf32>
      %167 = arith.mulf %166, %160 : vector<8x256xf32>
      %168 = arith.addf %135, %167 : vector<8x256xf32>
      %c30 = arith.constant 30 : index
      %169 = memref.load %arg2[%c30] : memref<98xf32, #tpu.memory_space<smem>>
      %170 = vector.broadcast %169 : f32 to vector<8x256xf32>
      %171 = arith.mulf %170, %160 : vector<8x256xf32>
      %172 = arith.addf %139, %171 : vector<8x256xf32>
      %c31 = arith.constant 31 : index
      %173 = memref.load %arg2[%c31] : memref<98xf32, #tpu.memory_space<smem>>
      %174 = vector.broadcast %173 : f32 to vector<8x256xf32>
      %175 = arith.mulf %174, %160 : vector<8x256xf32>
      %176 = arith.addf %143, %175 : vector<8x256xf32>
      %c32 = arith.constant 32 : index
      %177 = memref.load %arg2[%c32] : memref<98xf32, #tpu.memory_space<smem>>
      %178 = vector.broadcast %177 : f32 to vector<8x256xf32>
      %179 = arith.mulf %178, %160 : vector<8x256xf32>
      %180 = arith.addf %147, %179 : vector<8x256xf32>
      %c33 = arith.constant 33 : index
      %181 = memref.load %arg2[%c33] : memref<98xf32, #tpu.memory_space<smem>>
      %182 = vector.broadcast %181 : f32 to vector<8x256xf32>
      %183 = arith.mulf %182, %160 : vector<8x256xf32>
      %184 = arith.addf %151, %183 : vector<8x256xf32>
      %c34 = arith.constant 34 : index
      %185 = memref.load %arg2[%c34] : memref<98xf32, #tpu.memory_space<smem>>
      %186 = vector.broadcast %185 : f32 to vector<8x256xf32>
      %187 = arith.mulf %186, %160 : vector<8x256xf32>
      %188 = arith.addf %155, %187 : vector<8x256xf32>
      %c224_i32 = arith.constant 224 : i32
      %189 = tpu.dynamic_rotate %17 by %c224_i32 dim 1 : vector<8x256xf32>, i32 -> vector<8x256xf32>
      %c224_i32_33 = arith.constant 224 : i32
      %190 = vector.broadcast %c224_i32_33 : i32 to vector<8x256xi32>
      %191 = arith.cmpi slt, %19, %190 : vector<8x256xi32>
      %cst_34 = arith.constant 0.000000e+00 : f32
      %192 = vector.broadcast %cst_34 : f32 to vector<8x256xf32>
      %193 = arith.select %191, %189, %192 : vector<8x256xi1>, vector<8x256xf32>
      %c35 = arith.constant 35 : index
      %194 = memref.load %arg2[%c35] : memref<98xf32, #tpu.memory_space<smem>>
      %195 = vector.broadcast %194 : f32 to vector<8x256xf32>
      %196 = arith.mulf %195, %193 : vector<8x256xf32>
      %197 = arith.addf %164, %196 : vector<8x256xf32>
      %c36 = arith.constant 36 : index
      %198 = memref.load %arg2[%c36] : memref<98xf32, #tpu.memory_space<smem>>
      %199 = vector.broadcast %198 : f32 to vector<8x256xf32>
      %200 = arith.mulf %199, %193 : vector<8x256xf32>
      %201 = arith.addf %168, %200 : vector<8x256xf32>
      %c37 = arith.constant 37 : index
      %202 = memref.load %arg2[%c37] : memref<98xf32, #tpu.memory_space<smem>>
      %203 = vector.broadcast %202 : f32 to vector<8x256xf32>
      %204 = arith.mulf %203, %193 : vector<8x256xf32>
      %205 = arith.addf %172, %204 : vector<8x256xf32>
      %c38 = arith.constant 38 : index
      %206 = memref.load %arg2[%c38] : memref<98xf32, #tpu.memory_space<smem>>
      %207 = vector.broadcast %206 : f32 to vector<8x256xf32>
      %208 = arith.mulf %207, %193 : vector<8x256xf32>
      %209 = arith.addf %176, %208 : vector<8x256xf32>
      %c39 = arith.constant 39 : index
      %210 = memref.load %arg2[%c39] : memref<98xf32, #tpu.memory_space<smem>>
      %211 = vector.broadcast %210 : f32 to vector<8x256xf32>
      %212 = arith.mulf %211, %193 : vector<8x256xf32>
      %213 = arith.addf %180, %212 : vector<8x256xf32>
      %c40 = arith.constant 40 : index
      %214 = memref.load %arg2[%c40] : memref<98xf32, #tpu.memory_space<smem>>
      %215 = vector.broadcast %214 : f32 to vector<8x256xf32>
      %216 = arith.mulf %215, %193 : vector<8x256xf32>
      %217 = arith.addf %184, %216 : vector<8x256xf32>
      %c41 = arith.constant 41 : index
      %218 = memref.load %arg2[%c41] : memref<98xf32, #tpu.memory_space<smem>>
      %219 = vector.broadcast %218 : f32 to vector<8x256xf32>
      %220 = arith.mulf %219, %193 : vector<8x256xf32>
      %221 = arith.addf %188, %220 : vector<8x256xf32>
      %c208_i32 = arith.constant 208 : i32
      %222 = tpu.dynamic_rotate %17 by %c208_i32 dim 1 : vector<8x256xf32>, i32 -> vector<8x256xf32>
      %c208_i32_35 = arith.constant 208 : i32
      %223 = vector.broadcast %c208_i32_35 : i32 to vector<8x256xi32>
      %224 = arith.cmpi slt, %19, %223 : vector<8x256xi32>
      %cst_36 = arith.constant 0.000000e+00 : f32
      %225 = vector.broadcast %cst_36 : f32 to vector<8x256xf32>
      %226 = arith.select %224, %222, %225 : vector<8x256xi1>, vector<8x256xf32>
      %c42 = arith.constant 42 : index
      %227 = memref.load %arg2[%c42] : memref<98xf32, #tpu.memory_space<smem>>
      %228 = vector.broadcast %227 : f32 to vector<8x256xf32>
      %229 = arith.mulf %228, %226 : vector<8x256xf32>
      %230 = arith.addf %197, %229 : vector<8x256xf32>
      %c43 = arith.constant 43 : index
      %231 = memref.load %arg2[%c43] : memref<98xf32, #tpu.memory_space<smem>>
      %232 = vector.broadcast %231 : f32 to vector<8x256xf32>
      %233 = arith.mulf %232, %226 : vector<8x256xf32>
      %234 = arith.addf %201, %233 : vector<8x256xf32>
      %c44 = arith.constant 44 : index
      %235 = memref.load %arg2[%c44] : memref<98xf32, #tpu.memory_space<smem>>
      %236 = vector.broadcast %235 : f32 to vector<8x256xf32>
      %237 = arith.mulf %236, %226 : vector<8x256xf32>
      %238 = arith.addf %205, %237 : vector<8x256xf32>
      %c45 = arith.constant 45 : index
      %239 = memref.load %arg2[%c45] : memref<98xf32, #tpu.memory_space<smem>>
      %240 = vector.broadcast %239 : f32 to vector<8x256xf32>
      %241 = arith.mulf %240, %226 : vector<8x256xf32>
      %242 = arith.addf %209, %241 : vector<8x256xf32>
      %c46 = arith.constant 46 : index
      %243 = memref.load %arg2[%c46] : memref<98xf32, #tpu.memory_space<smem>>
      %244 = vector.broadcast %243 : f32 to vector<8x256xf32>
      %245 = arith.mulf %244, %226 : vector<8x256xf32>
      %246 = arith.addf %213, %245 : vector<8x256xf32>
      %c47 = arith.constant 47 : index
      %247 = memref.load %arg2[%c47] : memref<98xf32, #tpu.memory_space<smem>>
      %248 = vector.broadcast %247 : f32 to vector<8x256xf32>
      %249 = arith.mulf %248, %226 : vector<8x256xf32>
      %250 = arith.addf %217, %249 : vector<8x256xf32>
      %c48 = arith.constant 48 : index
      %251 = memref.load %arg2[%c48] : memref<98xf32, #tpu.memory_space<smem>>
      %252 = vector.broadcast %251 : f32 to vector<8x256xf32>
      %253 = arith.mulf %252, %226 : vector<8x256xf32>
      %254 = arith.addf %221, %253 : vector<8x256xf32>
      %c48_i32_37 = arith.constant 48 : i32
      %255 = tpu.dynamic_rotate %18 by %c48_i32_37 dim 1 : vector<8x256xf32>, i32 -> vector<8x256xf32>
      %c48_i32_38 = arith.constant 48 : i32
      %256 = vector.broadcast %c48_i32_38 : i32 to vector<8x256xi32>
      %257 = arith.cmpi sge, %19, %256 : vector<8x256xi32>
      %cst_39 = arith.constant 0.000000e+00 : f32
      %258 = vector.broadcast %cst_39 : f32 to vector<8x256xf32>
      %259 = arith.select %257, %255, %258 : vector<8x256xi1>, vector<8x256xf32>
      %c49 = arith.constant 49 : index
      %260 = memref.load %arg2[%c49] : memref<98xf32, #tpu.memory_space<smem>>
      %261 = vector.broadcast %260 : f32 to vector<8x256xf32>
      %262 = arith.mulf %261, %259 : vector<8x256xf32>
      %263 = arith.addf %230, %262 : vector<8x256xf32>
      %c50 = arith.constant 50 : index
      %264 = memref.load %arg2[%c50] : memref<98xf32, #tpu.memory_space<smem>>
      %265 = vector.broadcast %264 : f32 to vector<8x256xf32>
      %266 = arith.mulf %265, %259 : vector<8x256xf32>
      %267 = arith.addf %234, %266 : vector<8x256xf32>
      %c51 = arith.constant 51 : index
      %268 = memref.load %arg2[%c51] : memref<98xf32, #tpu.memory_space<smem>>
      %269 = vector.broadcast %268 : f32 to vector<8x256xf32>
      %270 = arith.mulf %269, %259 : vector<8x256xf32>
      %271 = arith.addf %238, %270 : vector<8x256xf32>
      %c52 = arith.constant 52 : index
      %272 = memref.load %arg2[%c52] : memref<98xf32, #tpu.memory_space<smem>>
      %273 = vector.broadcast %272 : f32 to vector<8x256xf32>
      %274 = arith.mulf %273, %259 : vector<8x256xf32>
      %275 = arith.addf %242, %274 : vector<8x256xf32>
      %c53 = arith.constant 53 : index
      %276 = memref.load %arg2[%c53] : memref<98xf32, #tpu.memory_space<smem>>
      %277 = vector.broadcast %276 : f32 to vector<8x256xf32>
      %278 = arith.mulf %277, %259 : vector<8x256xf32>
      %279 = arith.addf %246, %278 : vector<8x256xf32>
      %c54 = arith.constant 54 : index
      %280 = memref.load %arg2[%c54] : memref<98xf32, #tpu.memory_space<smem>>
      %281 = vector.broadcast %280 : f32 to vector<8x256xf32>
      %282 = arith.mulf %281, %259 : vector<8x256xf32>
      %283 = arith.addf %250, %282 : vector<8x256xf32>
      %c55 = arith.constant 55 : index
      %284 = memref.load %arg2[%c55] : memref<98xf32, #tpu.memory_space<smem>>
      %285 = vector.broadcast %284 : f32 to vector<8x256xf32>
      %286 = arith.mulf %285, %259 : vector<8x256xf32>
      %287 = arith.addf %254, %286 : vector<8x256xf32>
      %c32_i32_40 = arith.constant 32 : i32
      %288 = tpu.dynamic_rotate %18 by %c32_i32_40 dim 1 : vector<8x256xf32>, i32 -> vector<8x256xf32>
      %c32_i32_41 = arith.constant 32 : i32
      %289 = vector.broadcast %c32_i32_41 : i32 to vector<8x256xi32>
      %290 = arith.cmpi sge, %19, %289 : vector<8x256xi32>
      %cst_42 = arith.constant 0.000000e+00 : f32
      %291 = vector.broadcast %cst_42 : f32 to vector<8x256xf32>
      %292 = arith.select %290, %288, %291 : vector<8x256xi1>, vector<8x256xf32>
      %c56 = arith.constant 56 : index
      %293 = memref.load %arg2[%c56] : memref<98xf32, #tpu.memory_space<smem>>
      %294 = vector.broadcast %293 : f32 to vector<8x256xf32>
      %295 = arith.mulf %294, %292 : vector<8x256xf32>
      %296 = arith.addf %263, %295 : vector<8x256xf32>
      %c57 = arith.constant 57 : index
      %297 = memref.load %arg2[%c57] : memref<98xf32, #tpu.memory_space<smem>>
      %298 = vector.broadcast %297 : f32 to vector<8x256xf32>
      %299 = arith.mulf %298, %292 : vector<8x256xf32>
      %300 = arith.addf %267, %299 : vector<8x256xf32>
      %c58 = arith.constant 58 : index
      %301 = memref.load %arg2[%c58] : memref<98xf32, #tpu.memory_space<smem>>
      %302 = vector.broadcast %301 : f32 to vector<8x256xf32>
      %303 = arith.mulf %302, %292 : vector<8x256xf32>
      %304 = arith.addf %271, %303 : vector<8x256xf32>
      %c59 = arith.constant 59 : index
      %305 = memref.load %arg2[%c59] : memref<98xf32, #tpu.memory_space<smem>>
      %306 = vector.broadcast %305 : f32 to vector<8x256xf32>
      %307 = arith.mulf %306, %292 : vector<8x256xf32>
      %308 = arith.addf %275, %307 : vector<8x256xf32>
      %c60 = arith.constant 60 : index
      %309 = memref.load %arg2[%c60] : memref<98xf32, #tpu.memory_space<smem>>
      %310 = vector.broadcast %309 : f32 to vector<8x256xf32>
      %311 = arith.mulf %310, %292 : vector<8x256xf32>
      %312 = arith.addf %279, %311 : vector<8x256xf32>
      %c61 = arith.constant 61 : index
      %313 = memref.load %arg2[%c61] : memref<98xf32, #tpu.memory_space<smem>>
      %314 = vector.broadcast %313 : f32 to vector<8x256xf32>
      %315 = arith.mulf %314, %292 : vector<8x256xf32>
      %316 = arith.addf %283, %315 : vector<8x256xf32>
      %c62 = arith.constant 62 : index
      %317 = memref.load %arg2[%c62] : memref<98xf32, #tpu.memory_space<smem>>
      %318 = vector.broadcast %317 : f32 to vector<8x256xf32>
      %319 = arith.mulf %318, %292 : vector<8x256xf32>
      %320 = arith.addf %287, %319 : vector<8x256xf32>
      %c16_i32_43 = arith.constant 16 : i32
      %321 = tpu.dynamic_rotate %18 by %c16_i32_43 dim 1 : vector<8x256xf32>, i32 -> vector<8x256xf32>
      %c16_i32_44 = arith.constant 16 : i32
      %322 = vector.broadcast %c16_i32_44 : i32 to vector<8x256xi32>
      %323 = arith.cmpi sge, %19, %322 : vector<8x256xi32>
      %cst_45 = arith.constant 0.000000e+00 : f32
      %324 = vector.broadcast %cst_45 : f32 to vector<8x256xf32>
      %325 = arith.select %323, %321, %324 : vector<8x256xi1>, vector<8x256xf32>
      %c63 = arith.constant 63 : index
      %326 = memref.load %arg2[%c63] : memref<98xf32, #tpu.memory_space<smem>>
      %327 = vector.broadcast %326 : f32 to vector<8x256xf32>
      %328 = arith.mulf %327, %325 : vector<8x256xf32>
      %329 = arith.addf %296, %328 : vector<8x256xf32>
      %c64 = arith.constant 64 : index
      %330 = memref.load %arg2[%c64] : memref<98xf32, #tpu.memory_space<smem>>
      %331 = vector.broadcast %330 : f32 to vector<8x256xf32>
      %332 = arith.mulf %331, %325 : vector<8x256xf32>
      %333 = arith.addf %300, %332 : vector<8x256xf32>
      %c65 = arith.constant 65 : index
      %334 = memref.load %arg2[%c65] : memref<98xf32, #tpu.memory_space<smem>>
      %335 = vector.broadcast %334 : f32 to vector<8x256xf32>
      %336 = arith.mulf %335, %325 : vector<8x256xf32>
      %337 = arith.addf %304, %336 : vector<8x256xf32>
      %c66 = arith.constant 66 : index
      %338 = memref.load %arg2[%c66] : memref<98xf32, #tpu.memory_space<smem>>
      %339 = vector.broadcast %338 : f32 to vector<8x256xf32>
      %340 = arith.mulf %339, %325 : vector<8x256xf32>
      %341 = arith.addf %308, %340 : vector<8x256xf32>
      %c67 = arith.constant 67 : index
      %342 = memref.load %arg2[%c67] : memref<98xf32, #tpu.memory_space<smem>>
      %343 = vector.broadcast %342 : f32 to vector<8x256xf32>
      %344 = arith.mulf %343, %325 : vector<8x256xf32>
      %345 = arith.addf %312, %344 : vector<8x256xf32>
      %c68 = arith.constant 68 : index
      %346 = memref.load %arg2[%c68] : memref<98xf32, #tpu.memory_space<smem>>
      %347 = vector.broadcast %346 : f32 to vector<8x256xf32>
      %348 = arith.mulf %347, %325 : vector<8x256xf32>
      %349 = arith.addf %316, %348 : vector<8x256xf32>
      %c69 = arith.constant 69 : index
      %350 = memref.load %arg2[%c69] : memref<98xf32, #tpu.memory_space<smem>>
      %351 = vector.broadcast %350 : f32 to vector<8x256xf32>
      %352 = arith.mulf %351, %325 : vector<8x256xf32>
      %353 = arith.addf %320, %352 : vector<8x256xf32>
      %c70 = arith.constant 70 : index
      %354 = memref.load %arg2[%c70] : memref<98xf32, #tpu.memory_space<smem>>
      %355 = vector.broadcast %354 : f32 to vector<8x256xf32>
      %356 = arith.mulf %355, %18 : vector<8x256xf32>
      %357 = arith.addf %329, %356 : vector<8x256xf32>
      %c71 = arith.constant 71 : index
      %358 = memref.load %arg2[%c71] : memref<98xf32, #tpu.memory_space<smem>>
      %359 = vector.broadcast %358 : f32 to vector<8x256xf32>
      %360 = arith.mulf %359, %18 : vector<8x256xf32>
      %361 = arith.addf %333, %360 : vector<8x256xf32>
      %c72 = arith.constant 72 : index
      %362 = memref.load %arg2[%c72] : memref<98xf32, #tpu.memory_space<smem>>
      %363 = vector.broadcast %362 : f32 to vector<8x256xf32>
      %364 = arith.mulf %363, %18 : vector<8x256xf32>
      %365 = arith.addf %337, %364 : vector<8x256xf32>
      %c73 = arith.constant 73 : index
      %366 = memref.load %arg2[%c73] : memref<98xf32, #tpu.memory_space<smem>>
      %367 = vector.broadcast %366 : f32 to vector<8x256xf32>
      %368 = arith.mulf %367, %18 : vector<8x256xf32>
      %369 = arith.addf %341, %368 : vector<8x256xf32>
      %c74 = arith.constant 74 : index
      %370 = memref.load %arg2[%c74] : memref<98xf32, #tpu.memory_space<smem>>
      %371 = vector.broadcast %370 : f32 to vector<8x256xf32>
      %372 = arith.mulf %371, %18 : vector<8x256xf32>
      %373 = arith.addf %345, %372 : vector<8x256xf32>
      %c75 = arith.constant 75 : index
      %374 = memref.load %arg2[%c75] : memref<98xf32, #tpu.memory_space<smem>>
      %375 = vector.broadcast %374 : f32 to vector<8x256xf32>
      %376 = arith.mulf %375, %18 : vector<8x256xf32>
      %377 = arith.addf %349, %376 : vector<8x256xf32>
      %c76 = arith.constant 76 : index
      %378 = memref.load %arg2[%c76] : memref<98xf32, #tpu.memory_space<smem>>
      %379 = vector.broadcast %378 : f32 to vector<8x256xf32>
      %380 = arith.mulf %379, %18 : vector<8x256xf32>
      %381 = arith.addf %353, %380 : vector<8x256xf32>
      %c240_i32_46 = arith.constant 240 : i32
      %382 = tpu.dynamic_rotate %18 by %c240_i32_46 dim 1 : vector<8x256xf32>, i32 -> vector<8x256xf32>
      %c240_i32_47 = arith.constant 240 : i32
      %383 = vector.broadcast %c240_i32_47 : i32 to vector<8x256xi32>
      %384 = arith.cmpi slt, %19, %383 : vector<8x256xi32>
      %cst_48 = arith.constant 0.000000e+00 : f32
      %385 = vector.broadcast %cst_48 : f32 to vector<8x256xf32>
      %386 = arith.select %384, %382, %385 : vector<8x256xi1>, vector<8x256xf32>
      %c77 = arith.constant 77 : index
      %387 = memref.load %arg2[%c77] : memref<98xf32, #tpu.memory_space<smem>>
      %388 = vector.broadcast %387 : f32 to vector<8x256xf32>
      %389 = arith.mulf %388, %386 : vector<8x256xf32>
      %390 = arith.addf %357, %389 : vector<8x256xf32>
      %c78 = arith.constant 78 : index
      %391 = memref.load %arg2[%c78] : memref<98xf32, #tpu.memory_space<smem>>
      %392 = vector.broadcast %391 : f32 to vector<8x256xf32>
      %393 = arith.mulf %392, %386 : vector<8x256xf32>
      %394 = arith.addf %361, %393 : vector<8x256xf32>
      %c79 = arith.constant 79 : index
      %395 = memref.load %arg2[%c79] : memref<98xf32, #tpu.memory_space<smem>>
      %396 = vector.broadcast %395 : f32 to vector<8x256xf32>
      %397 = arith.mulf %396, %386 : vector<8x256xf32>
      %398 = arith.addf %365, %397 : vector<8x256xf32>
      %c80 = arith.constant 80 : index
      %399 = memref.load %arg2[%c80] : memref<98xf32, #tpu.memory_space<smem>>
      %400 = vector.broadcast %399 : f32 to vector<8x256xf32>
      %401 = arith.mulf %400, %386 : vector<8x256xf32>
      %402 = arith.addf %369, %401 : vector<8x256xf32>
      %c81 = arith.constant 81 : index
      %403 = memref.load %arg2[%c81] : memref<98xf32, #tpu.memory_space<smem>>
      %404 = vector.broadcast %403 : f32 to vector<8x256xf32>
      %405 = arith.mulf %404, %386 : vector<8x256xf32>
      %406 = arith.addf %373, %405 : vector<8x256xf32>
      %c82 = arith.constant 82 : index
      %407 = memref.load %arg2[%c82] : memref<98xf32, #tpu.memory_space<smem>>
      %408 = vector.broadcast %407 : f32 to vector<8x256xf32>
      %409 = arith.mulf %408, %386 : vector<8x256xf32>
      %410 = arith.addf %377, %409 : vector<8x256xf32>
      %c83 = arith.constant 83 : index
      %411 = memref.load %arg2[%c83] : memref<98xf32, #tpu.memory_space<smem>>
      %412 = vector.broadcast %411 : f32 to vector<8x256xf32>
      %413 = arith.mulf %412, %386 : vector<8x256xf32>
      %414 = arith.addf %381, %413 : vector<8x256xf32>
      %c224_i32_49 = arith.constant 224 : i32
      %415 = tpu.dynamic_rotate %18 by %c224_i32_49 dim 1 : vector<8x256xf32>, i32 -> vector<8x256xf32>
      %c224_i32_50 = arith.constant 224 : i32
      %416 = vector.broadcast %c224_i32_50 : i32 to vector<8x256xi32>
      %417 = arith.cmpi slt, %19, %416 : vector<8x256xi32>
      %cst_51 = arith.constant 0.000000e+00 : f32
      %418 = vector.broadcast %cst_51 : f32 to vector<8x256xf32>
      %419 = arith.select %417, %415, %418 : vector<8x256xi1>, vector<8x256xf32>
      %c84 = arith.constant 84 : index
      %420 = memref.load %arg2[%c84] : memref<98xf32, #tpu.memory_space<smem>>
      %421 = vector.broadcast %420 : f32 to vector<8x256xf32>
      %422 = arith.mulf %421, %419 : vector<8x256xf32>
      %423 = arith.addf %390, %422 : vector<8x256xf32>
      %c85 = arith.constant 85 : index
      %424 = memref.load %arg2[%c85] : memref<98xf32, #tpu.memory_space<smem>>
      %425 = vector.broadcast %424 : f32 to vector<8x256xf32>
      %426 = arith.mulf %425, %419 : vector<8x256xf32>
      %427 = arith.addf %394, %426 : vector<8x256xf32>
      %c86 = arith.constant 86 : index
      %428 = memref.load %arg2[%c86] : memref<98xf32, #tpu.memory_space<smem>>
      %429 = vector.broadcast %428 : f32 to vector<8x256xf32>
      %430 = arith.mulf %429, %419 : vector<8x256xf32>
      %431 = arith.addf %398, %430 : vector<8x256xf32>
      %c87 = arith.constant 87 : index
      %432 = memref.load %arg2[%c87] : memref<98xf32, #tpu.memory_space<smem>>
      %433 = vector.broadcast %432 : f32 to vector<8x256xf32>
      %434 = arith.mulf %433, %419 : vector<8x256xf32>
      %435 = arith.addf %402, %434 : vector<8x256xf32>
      %c88 = arith.constant 88 : index
      %436 = memref.load %arg2[%c88] : memref<98xf32, #tpu.memory_space<smem>>
      %437 = vector.broadcast %436 : f32 to vector<8x256xf32>
      %438 = arith.mulf %437, %419 : vector<8x256xf32>
      %439 = arith.addf %406, %438 : vector<8x256xf32>
      %c89 = arith.constant 89 : index
      %440 = memref.load %arg2[%c89] : memref<98xf32, #tpu.memory_space<smem>>
      %441 = vector.broadcast %440 : f32 to vector<8x256xf32>
      %442 = arith.mulf %441, %419 : vector<8x256xf32>
      %443 = arith.addf %410, %442 : vector<8x256xf32>
      %c90 = arith.constant 90 : index
      %444 = memref.load %arg2[%c90] : memref<98xf32, #tpu.memory_space<smem>>
      %445 = vector.broadcast %444 : f32 to vector<8x256xf32>
      %446 = arith.mulf %445, %419 : vector<8x256xf32>
      %447 = arith.addf %414, %446 : vector<8x256xf32>
      %c208_i32_52 = arith.constant 208 : i32
      %448 = tpu.dynamic_rotate %18 by %c208_i32_52 dim 1 : vector<8x256xf32>, i32 -> vector<8x256xf32>
      %c208_i32_53 = arith.constant 208 : i32
      %449 = vector.broadcast %c208_i32_53 : i32 to vector<8x256xi32>
      %450 = arith.cmpi slt, %19, %449 : vector<8x256xi32>
      %cst_54 = arith.constant 0.000000e+00 : f32
      %451 = vector.broadcast %cst_54 : f32 to vector<8x256xf32>
      %452 = arith.select %450, %448, %451 : vector<8x256xi1>, vector<8x256xf32>
      %c91 = arith.constant 91 : index
      %453 = memref.load %arg2[%c91] : memref<98xf32, #tpu.memory_space<smem>>
      %454 = vector.broadcast %453 : f32 to vector<8x256xf32>
      %455 = arith.mulf %454, %452 : vector<8x256xf32>
      %456 = arith.addf %423, %455 : vector<8x256xf32>
      %c92 = arith.constant 92 : index
      %457 = memref.load %arg2[%c92] : memref<98xf32, #tpu.memory_space<smem>>
      %458 = vector.broadcast %457 : f32 to vector<8x256xf32>
      %459 = arith.mulf %458, %452 : vector<8x256xf32>
      %460 = arith.addf %427, %459 : vector<8x256xf32>
      %c93 = arith.constant 93 : index
      %461 = memref.load %arg2[%c93] : memref<98xf32, #tpu.memory_space<smem>>
      %462 = vector.broadcast %461 : f32 to vector<8x256xf32>
      %463 = arith.mulf %462, %452 : vector<8x256xf32>
      %464 = arith.addf %431, %463 : vector<8x256xf32>
      %c94 = arith.constant 94 : index
      %465 = memref.load %arg2[%c94] : memref<98xf32, #tpu.memory_space<smem>>
      %466 = vector.broadcast %465 : f32 to vector<8x256xf32>
      %467 = arith.mulf %466, %452 : vector<8x256xf32>
      %468 = arith.addf %435, %467 : vector<8x256xf32>
      %c95 = arith.constant 95 : index
      %469 = memref.load %arg2[%c95] : memref<98xf32, #tpu.memory_space<smem>>
      %470 = vector.broadcast %469 : f32 to vector<8x256xf32>
      %471 = arith.mulf %470, %452 : vector<8x256xf32>
      %472 = arith.addf %439, %471 : vector<8x256xf32>
      %c96 = arith.constant 96 : index
      %473 = memref.load %arg2[%c96] : memref<98xf32, #tpu.memory_space<smem>>
      %474 = vector.broadcast %473 : f32 to vector<8x256xf32>
      %475 = arith.mulf %474, %452 : vector<8x256xf32>
      %476 = arith.addf %443, %475 : vector<8x256xf32>
      %c97 = arith.constant 97 : index
      %477 = memref.load %arg2[%c97] : memref<98xf32, #tpu.memory_space<smem>>
      %478 = vector.broadcast %477 : f32 to vector<8x256xf32>
      %479 = arith.mulf %478, %452 : vector<8x256xf32>
      %480 = arith.addf %447, %479 : vector<8x256xf32>
      %cst_55 = arith.constant 0.000000e+00 : f32
      %481 = vector.broadcast %cst_55 : f32 to vector<8x256xf32>
      %c3_i32 = arith.constant 3 : i32
      %482 = tpu.dynamic_rotate %456 by %c3_i32 dim 1 : vector<8x256xf32>, i32 -> vector<8x256xf32>
      %c3_i32_56 = arith.constant 3 : i32
      %483 = vector.broadcast %c3_i32_56 : i32 to vector<8x256xi32>
      %484 = arith.cmpi sge, %35, %483 : vector<8x256xi32>
      %cst_57 = arith.constant 0.000000e+00 : f32
      %485 = vector.broadcast %cst_57 : f32 to vector<8x256xf32>
      %486 = arith.select %484, %482, %485 : vector<8x256xi1>, vector<8x256xf32>
      %487 = arith.addf %481, %486 : vector<8x256xf32>
      %c2_i32 = arith.constant 2 : i32
      %488 = tpu.dynamic_rotate %460 by %c2_i32 dim 1 : vector<8x256xf32>, i32 -> vector<8x256xf32>
      %c2_i32_58 = arith.constant 2 : i32
      %489 = vector.broadcast %c2_i32_58 : i32 to vector<8x256xi32>
      %490 = arith.cmpi sge, %35, %489 : vector<8x256xi32>
      %cst_59 = arith.constant 0.000000e+00 : f32
      %491 = vector.broadcast %cst_59 : f32 to vector<8x256xf32>
      %492 = arith.select %490, %488, %491 : vector<8x256xi1>, vector<8x256xf32>
      %493 = arith.addf %487, %492 : vector<8x256xf32>
      %c1_i32_60 = arith.constant 1 : i32
      %494 = tpu.dynamic_rotate %464 by %c1_i32_60 dim 1 : vector<8x256xf32>, i32 -> vector<8x256xf32>
      %c1_i32_61 = arith.constant 1 : i32
      %495 = vector.broadcast %c1_i32_61 : i32 to vector<8x256xi32>
      %496 = arith.cmpi sge, %35, %495 : vector<8x256xi32>
      %cst_62 = arith.constant 0.000000e+00 : f32
      %497 = vector.broadcast %cst_62 : f32 to vector<8x256xf32>
      %498 = arith.select %496, %494, %497 : vector<8x256xi1>, vector<8x256xf32>
      %499 = arith.addf %493, %498 : vector<8x256xf32>
      %500 = arith.addf %499, %468 : vector<8x256xf32>
      %c255_i32 = arith.constant 255 : i32
      %501 = tpu.dynamic_rotate %472 by %c255_i32 dim 1 : vector<8x256xf32>, i32 -> vector<8x256xf32>
      %c15_i32 = arith.constant 15 : i32
      %502 = vector.broadcast %c15_i32 : i32 to vector<8x256xi32>
      %503 = arith.cmpi slt, %35, %502 : vector<8x256xi32>
      %cst_63 = arith.constant 0.000000e+00 : f32
      %504 = vector.broadcast %cst_63 : f32 to vector<8x256xf32>
      %505 = arith.select %503, %501, %504 : vector<8x256xi1>, vector<8x256xf32>
      %506 = arith.addf %500, %505 : vector<8x256xf32>
      %c254_i32 = arith.constant 254 : i32
      %507 = tpu.dynamic_rotate %476 by %c254_i32 dim 1 : vector<8x256xf32>, i32 -> vector<8x256xf32>
      %c14_i32 = arith.constant 14 : i32
      %508 = vector.broadcast %c14_i32 : i32 to vector<8x256xi32>
      %509 = arith.cmpi slt, %35, %508 : vector<8x256xi32>
      %cst_64 = arith.constant 0.000000e+00 : f32
      %510 = vector.broadcast %cst_64 : f32 to vector<8x256xf32>
      %511 = arith.select %509, %507, %510 : vector<8x256xi1>, vector<8x256xf32>
      %512 = arith.addf %506, %511 : vector<8x256xf32>
      %c253_i32 = arith.constant 253 : i32
      %513 = tpu.dynamic_rotate %480 by %c253_i32 dim 1 : vector<8x256xf32>, i32 -> vector<8x256xf32>
      %c13_i32 = arith.constant 13 : i32
      %514 = vector.broadcast %c13_i32 : i32 to vector<8x256xi32>
      %515 = arith.cmpi slt, %35, %514 : vector<8x256xi32>
      %cst_65 = arith.constant 0.000000e+00 : f32
      %516 = vector.broadcast %cst_65 : f32 to vector<8x256xf32>
      %517 = arith.select %515, %513, %516 : vector<8x256xi1>, vector<8x256xf32>
      %518 = arith.addf %512, %517 : vector<8x256xf32>
      %519 = arith.negf %518 : vector<8x256xf32>
      %520 = math.exp %519 : vector<8x256xf32>
      %cst_66 = arith.constant 1.000000e+00 : f32
      %521 = vector.broadcast %cst_66 : f32 to vector<8x256xf32>
      %522 = arith.addf %521, %520 : vector<8x256xf32>
      %523 = arith.divf %521, %522 : vector<8x256xf32>
      %c0_67 = arith.constant 0 : index
      %c0_68 = arith.constant 0 : index
      %524 = vector.load %arg4[%c0_67, %c0_68] : memref<8x256xf32, #tpu.memory_space<vmem>>, vector<8x256xf32>
      tpu.vector_store %arg4[%c0_67, %c0_68], %523 {strides = array<i32>} : memref<8x256xf32, #tpu.memory_space<vmem>>, vector<8x256xf32>,
    } else {
    }
    return
  }
  func.func @transform_0(%arg0: i32, %arg1: i32) -> i32 {
    %c0_i32 = arith.constant 0 : i32
    %c0_i32_0 = arith.constant 0 : i32
    return %c0_i32 : i32
  }
  func.func @transform_1(%arg0: i32, %arg1: i32) -> (i32, i32, i32) {
    %c0_i32 = arith.constant 0 : i32
    %c0_i32_0 = arith.constant 0 : i32
    return %arg0, %arg1, %c0_i32 : i32, i32, i32
  }
  func.func @transform_2(%arg0: i32, %arg1: i32) -> (i32, i32) {
    %c0_i32 = arith.constant 0 : i32
    %c0_i32_0 = arith.constant 0 : i32
    return %arg0, %c0_i32 : i32, i32
  }
}

</mosaic_0001>

<bundles_post_ra>
// kernel: tpu_custom_call.1
= control target key start
LH: loop header
LB: loop body
LE: loop exit
PB: predicated region body
PF: predicated region fallthrough
CT: control target
= control target key end

     0   :  { %s2939_s0 = inlined_call_operand.hbm [shape: f32[98], index: 0, kind: input, shape index: {}]   ;;  %s2940_s1 = inlined_call_operand.hbm [shape: f32[8,4,256], index: 1, kind: input, shape index: {}]   ;;  %s2941_s2 = inlined_call_operand.hbm [shape: f32[8,256], index: 2, kind: output, shape index: {}]  }
   0x1   :  { %3069 = sst [smem:[#allocation125_spill]] %s2941_s2 }
   0x2   :  { %7 = vsyncpa [#allocation7], 0 }
   0x3   :  { %8 = vsyncpa [#allocation5], 0 }
   0x4   :  { %9 = vsyncpa [#allocation6], 0  ;;  %s1351_s11 = scalar_lea.hbm %s2939_s0, 16 }
   0x5   :  { %p1352_p0 = scmp.ne.s32.totalorder %s2939_s0, %s1351_s11  ;;  %p1355_p1 = scmp.lt.u32.totalorder %s1351_s11, %s2939_s0 }
   0x7   :  { %p1357_p2 = pnand %p1355_p1, %p1352_p0 }
   0x9   :  { %1360 = shalt.err (!%p1357_p2)
}
   0xa   :  { %s1411_s16 = smov [#allocation4]   ;;  %s1412_s19 = smov [#allocation8]  }
   0xb   :  { %17 = dma.hbm_to_smem %s2939_s0, 16, %s1411_s16, [#allocation7]  }
   0xc   :  { %s23_s20 = sshll.u32 %s1412_s19, 4  ;;  %s1361_s23 = scalar_lea.hbm %s2940_s1, 1024  ;;  %s24_s20 = int_to_ptr.vmem [resolvable:$true] %s23_s20 }
   0xd   :  { %p1362_p3 = scmp.ne.s32.totalorder %s2940_s1, %s1361_s23  ;;  %p1365_p4 = scmp.lt.u32.totalorder %s1361_s23, %s2940_s1 }
   0xf   :  { %p1367_p5 = pnand %p1365_p4, %p1362_p3 }
  0x11   :  { %1370 = shalt.err (!%p1367_p5)
}
  0x12   :  { %s1371_s28 = scalar_lea.vmem %s24_s20, 1024  ;;  %p1376_p7 = scmp.lt.s32.totalorder %s24_s20, %s24_s20 }
  0x13   :  { %p1372_p6 = scmp.ne.s32.totalorder %s24_s20, %s1371_s28  ;;  %p1377_p8 = scmp.lt.s32.totalorder %s1371_s28, %s1371_s28 }
  0x15   :  { %p1378_p9 = por %p1377_p8, %p1376_p7 }
  0x17   :  { %p1379_p10 = pnand %p1378_p9, %p1372_p6 }
  0x19   :  { %1382 = shalt.err (!%p1379_p10)
}
  0x1a   :  { %s1413_s0 = smov 128   ;;  %s1414_s29 = smov 8  }
  0x1b   :  { %29 = dma.hbm_to_vmem [thread:$0]  %s2940_s1, 1024, %s24_s20, [#allocation5], %s1413_s0, %s1413_s0, %s1414_s29  }
  0x1c   :  { %1405 = dma.done.wait [#allocation7], 16  }
  0x1d   :  { %1406 = vsyncadd [#allocation7], 4294967280 }
  0x1e   :  { %1407 = dma.done.wait [#allocation5], 1024  }
  0x1f   :  { %1408 = vsyncadd [#allocation5], 4294966272 }
  0x20   :  { %36 = sfence }
  0x21   :  { %v1467_v0 = vld [vmem:[#allocation8] sm:$0xff]  ;;  %v1469_v1 = vld [vmem:[#allocation8 + $0x8] sm:$0xff]  ;;  %v1471_v2 = vld [vmem:[#allocation8 + $0x10] sm:$0xff]  ;;  %vm79_vm0 = vcmask 1043456   ;;  %vm208_vm1 = vcmask 1041409   ;;  %vm210_vm2 = vcmask 1042434  }
  0x22   :  { %v1473_v3 = vld [vmem:[#allocation8 + $0x18] sm:$0xff]  ;;  %v1475_v4 = vld [vmem:[#allocation8 + $0x20] sm:$0xff]  ;;  %v1477_v5 = vld [vmem:[#allocation8 + $0x28] sm:$0xff]  ;;  %v80_v6 = vsel %vm79_vm0, %v1467_v0, 0.0  ;;  %v94_v7 = vsel %vm79_vm0, %v1469_v1, 0.0  ;;  %v108_v8 = vsel %vm79_vm0, %v1471_v2, 0.0  ;;  %v1487_v9 = vcombine.high %v1467_v0, %v1467_v0 }
  0x23   :  { %v1489_v10 = vld [vmem:[#allocation8 + $0x30] sm:$0xff]  ;;  %v1491_v11 = vld [vmem:[#allocation8 + $0x38] sm:$0xff]  ;;  %v81_v12 = vrot.slane %v80_v6, 4  ;;  %v95_v13 = vrot.slane %v94_v7, 4  ;;  %v109_v14 = vrot.slane %v108_v8, 4  ;;  %v122_v15 = vsel %vm79_vm0, %v1473_v3, 0.0 }
  0x24   :  { %v123_v16 = vrot.slane %v122_v15, 4  ;;  %v136_v17 = vsel %vm79_vm0, %v1475_v4, 0.0  ;;  %v150_v18 = vsel %vm79_vm0, %v1477_v5, 0.0  ;;  %v164_v19 = vsel %vm79_vm0, %v1489_v10, 0.0  ;;  %s1415_s1 = smov 32   ;;  %s1416_s4 = smov 48  }
  0x25   :  { %v82_v20 = vadd.f32 %v81_v12, %v80_v6  ;;  %v96_v21 = vadd.f32 %v95_v13, %v94_v7  ;;  %v110_v22 = vadd.f32 %v109_v14, %v108_v8  ;;  %v137_v23 = vrot.slane %v136_v17, 4  ;;  %s1417_s5 = smov 16   ;;  %s1418_s6 = smov 112  }
  0x26   :  { %v124_v24 = vadd.f32 %v123_v16, %v122_v15  ;;  %v151_v25 = vrot.slane %v150_v18, 4  ;;  %v165_v26 = vrot.slane %v164_v19, 4  ;;  %v178_v27 = vsel %vm79_vm0, %v1491_v11, 0.0  ;;  %s1419_s7 = smov 96   ;;  %s1420_s8 = smov 80  }
  0x27   :  { %v83_v28 = vrot.slane %v82_v20, 2  ;;  %v97_v29 = vrot.slane %v96_v21, 2  ;;  %v111_v30 = vrot.slane %v110_v22, 2  ;;  %v138_v31 = vadd.f32 %v137_v23, %v136_v17  ;;  %s1684_s9 = sld [smem:[#allocation4 + $0x7]]  ;;  %s1686_s10 = sld [smem:[#allocation4 + $0x8]] }
  0x28   :  { %v125_v32 = vrot.slane %v124_v24, 2  ;;  %v152_v33 = vadd.f32 %v151_v25, %v150_v18  ;;  %v166_v34 = vadd.f32 %v165_v26, %v164_v19  ;;  %v179_v35 = vrot.slane %v178_v27, 4  ;;  %s1688_s11 = sld [smem:[#allocation4 + $0x9]]  ;;  %s1690_s12 = sld [smem:[#allocation4 + $0xa]] }
  0x29   :  { %v84_v36 = vadd.f32 %v83_v28, %v82_v20  ;;  %v98_v37 = vadd.f32 %v97_v29, %v96_v21  ;;  %v112_v38 = vadd.f32 %v111_v30, %v110_v22  ;;  %v139_v39 = vrot.slane %v138_v31, 2  ;;  %s1692_s13 = sld [smem:[#allocation4 + $0xb]]  ;;  %s1694_s14 = sld [smem:[#allocation4 + $0xc]] }
  0x2a   :  { %v126_v40 = vadd.f32 %v125_v32, %v124_v24  ;;  %v153_v41 = vrot.slane %v152_v33, 2  ;;  %v167_v42 = vrot.slane %v166_v34, 2  ;;  %v180_v43 = vadd.f32 %v179_v35, %v178_v27  ;;  %s1696_s15 = sld [smem:[#allocation4 + $0xd]]  ;;  %s1698_s16 = sld [smem:[#allocation4 + $0xe]] }
  0x2b   :  { %v85_v44 = vrot.slane %v84_v36, 1  ;;  %v99_v45 = vrot.slane %v98_v37, 1  ;;  %v113_v46 = vrot.slane %v112_v38, 1  ;;  %v140_v47 = vadd.f32 %v139_v39, %v138_v31  ;;  %s1700_s17 = sld [smem:[#allocation4 + $0xf]]  ;;  %s1702_s18 = sld [smem:[#allocation4 + $0x10]] }
  0x2c   :  { %v127_v48 = vrot.slane %v126_v40, 1  ;;  %v154_v49 = vadd.f32 %v153_v41, %v152_v33  ;;  %v168_v50 = vadd.f32 %v167_v42, %v166_v34  ;;  %v181_v51 = vrot.slane %v180_v43, 2  ;;  %s1704_s19 = sld [smem:[#allocation4 + $0x11]]  ;;  %s1706_s20 = sld [smem:[#allocation4 + $0x12]] }
  0x2d   :  { %v86_v52 = vadd.f32 %v85_v44, %v84_v36  ;;  %v100_v53 = vadd.f32 %v99_v45, %v98_v37  ;;  %v114_v54 = vadd.f32 %v113_v46, %v112_v38  ;;  %v141_v55 = vrot.slane %v140_v47, 1  ;;  %3071 = sst [smem:[#allocation14_spill]] %s1684_s9  ;;  %s1708_s21 = sld [smem:[#allocation4 + $0x13]] }
  0x2e   :  { %v128_v56 = vadd.f32 %v127_v48, %v126_v40  ;;  %v155_v57 = vrot.slane %v154_v49, 1  ;;  %v169_v58 = vrot.slane %v168_v50, 1  ;;  %v182_v59 = vadd.f32 %v181_v51, %v180_v43  ;;  %3072 = sst [smem:[#allocation15_spill]] %s1686_s10  ;;  %s1710_s22 = sld [smem:[#allocation4 + $0x14]] }
  0x2f   :  { %v142_v60 = vadd.f32 %v141_v55, %v140_v47  ;;  %v209_v61 = vsel %vm208_vm1, %v100_v53, %v86_v52  ;;  %vm212_vm3 = vcmask 1043459   ;;  %vm214_vm4 = vcmask 1044484   ;;  %3073 = sst [smem:[#allocation16_spill]] %s1688_s11  ;;  %s1712_s23 = sld [smem:[#allocation4 + $0x1c]] }
  0x30   :  { %v156_v62 = vadd.f32 %v155_v57, %v154_v49  ;;  %v170_v63 = vadd.f32 %v169_v58, %v168_v50  ;;  %v183_v6 = vrot.slane %v182_v59, 1  ;;  %v211_v7 = vsel %vm210_vm2, %v114_v54, %v209_v61  ;;  %3074 = sst [smem:[#allocation17_spill]] %s1690_s12  ;;  %s1714_s24 = sld [smem:[#allocation4 + $0x1d]] }
  0x31   :  { %v213_v8 = vsel %vm212_vm3, %v128_v56, %v211_v7  ;;  %vm216_vm5 = vcmask 1045509   ;;  %vm218_vm6 = vcmask 1046534   ;;  %vm220_vm7 = vcmask 1047559   ;;  %3075 = sst [smem:[#allocation18_spill]] %s1692_s13  ;;  %s1716_s25 = sld [smem:[#allocation4 + $0x1e]] }
  0x32   :  { %v184_v12 = vadd.f32 %v183_v6, %v182_v59  ;;  %v215_v13 = vsel %vm214_vm4, %v142_v60, %v213_v8  ;;  %v1509_v14 = vcombine.high %v1469_v1, %v1469_v1  ;;  %v1513_v15 = vcombine.high %v1471_v2, %v1471_v2  ;;  %3076 = sst [smem:[#allocation19_spill]] %s1694_s14  ;;  %s1718_s26 = sld [smem:[#allocation4 + $0x1f]] }
  0x33   :  { %v217_v16 = vsel %vm216_vm5, %v156_v62, %v215_v13  ;;  %v1518_v17 = vcombine.high %v1473_v3, %v1473_v3  ;;  %v1522_v18 = vcombine.high %v1475_v4, %v1475_v4  ;;  %v1526_v19 = vcombine.high %v1477_v5, %v1477_v5  ;;  %3077 = sst [smem:[#allocation20_spill]] %s1696_s15  ;;  %s1720_s27 = sld [smem:[#allocation4 + $0x20]] }
  0x34   :  { %v219_v20 = vsel %vm218_vm6, %v170_v63, %v217_v16  ;;  %v1531_v21 = vcombine.high %v1489_v10, %v1489_v10  ;;  %v1535_v22 = vcombine.high %v1491_v11, %v1491_v11  ;;  %v101_v23 = vsel %vm79_vm0, %v1509_v14, 0.0  ;;  %3078 = sst [smem:[#allocation21_spill]] %s1698_s16  ;;  %s1722_s28 = sld [smem:[#allocation4 + $0x21]] }
  0x35   :  { %v221_v24 = vsel %vm220_vm7, %v184_v12, %v219_v20  ;;  %v102_v25 = vrot.slane %v101_v23, 4  ;;  %v115_v26 = vsel %vm79_vm0, %v1513_v15, 0.0  ;;  %v129_v27 = vsel %vm79_vm0, %v1518_v17, 0.0  ;;  %3079 = sst [smem:[#allocation22_spill]] %s1700_s17  ;;  %s1724_s0 = sld [smem:[#allocation4 + $0x22]] }
  0x36   :  { %v1544_v28 = vmul.f32 0.25, %v221_v24  ;;  %v116_v29 = vrot.slane %v115_v26, 4  ;;  %v130_v30 = vrot.slane %v129_v27, 4  ;;  %v143_v31 = vsel %vm79_vm0, %v1522_v18, 0.0  ;;  %3080 = sst [smem:[#allocation23_spill]] %s1702_s18  ;;  %s1726_s29 = sld [smem:[#allocation4 + $0x23]] }
  0x37   :  { %v103_v32 = vadd.f32 %v102_v25, %v101_v23  ;;  %v144_v33 = vrot.slane %v143_v31, 4  ;;  %v157_v34 = vsel %vm79_vm0, %v1526_v19, 0.0  ;;  %v171_v35 = vsel %vm79_vm0, %v1531_v21, 0.0  ;;  %3081 = sst [smem:[#allocation24_spill]] %s1704_s19  ;;  %s1728_s30 = sld [smem:[#allocation4 + $0x24]] }
  0x38   :  { %460 = vrot.lane.b32.xlu1 %v1544_v28, %s1415_s1  ;;  %421 = vrot.lane.b32.xlu0 %v1544_v28, %s1416_s4  ;;  %v117_v36 = vadd.f32 %v116_v29, %v115_v26  ;;  %v131_v37 = vadd.f32 %v130_v30, %v129_v27  ;;  %v158_v38 = vrot.slane %v157_v34, 4  ;;  %v172_v39 = vrot.slane %v171_v35, 4  ;;  %3082 = sst [smem:[#allocation25_spill]] %s1706_s20  ;;  %s1730_s3 = sld [smem:[#allocation4 + $0x25]] }
  0x39   :  { %v104_v40 = vrot.slane %v103_v32, 2  ;;  %v145_v41 = vadd.f32 %v144_v33, %v143_v31  ;;  %v185_v42 = vsel %vm79_vm0, %v1535_v22, 0.0  ;;  %v244_v43 = vsel %vm79_vm0, %v1487_v9, -inf  ;;  %3083 = sst [smem:[#allocation26_spill]] %s1708_s21  ;;  %s1744_s2 = sld [smem:[#allocation4 + $0x2]] }
  0x3a   :  { %v118_v44 = vrot.slane %v117_v36, 2  ;;  %v132_v45 = vrot.slane %v131_v37, 2  ;;  %v159_v46 = vadd.f32 %v158_v38, %v157_v34  ;;  %v173_v47 = vadd.f32 %v172_v39, %v171_v35  ;;  %3084 = sst [smem:[#allocation27_spill]] %s1710_s22  ;;  %s1870_s21 = sld [smem:[#allocation4 + $0x4e]] }
  0x3b   :  { %v105_v48 = vadd.f32 %v104_v40, %v103_v32  ;;  %v146_v49 = vrot.slane %v145_v41, 2  ;;  %v186_v50 = vrot.slane %v185_v42, 4  ;;  %v245_v51 = vrot.slane %v244_v43, 4  ;;  %3085 = sst [smem:[#allocation28_spill]] %s1712_s23  ;;  %s1830_s23 = sld [smem:[#allocation4 + $0x3b]] }
  0x3c   :  { %513 = vrot.lane.b32.xlu0 %v1544_v28, %s1417_s5  ;;  %v119_v52 = vadd.f32 %v118_v44, %v117_v36  ;;  %v133_v53 = vadd.f32 %v132_v45, %v131_v37  ;;  %v160_v54 = vrot.slane %v159_v46, 2  ;;  %v174_v55 = vrot.slane %v173_v47, 2  ;;  %3086 = sst [smem:[#allocation29_spill]] %s1714_s24  ;;  %s1930_s22 = sld [smem:[#allocation4 + $0x48]] }
  0x3d   :  { %v106_v56 = vrot.slane %v105_v48, 1  ;;  %v147_v57 = vadd.f32 %v146_v49, %v145_v41  ;;  %v187_v58 = vadd.f32 %v186_v50, %v185_v42  ;;  %v246_v59 = vmax.f32 %v244_v43, %v245_v51  ;;  %3087 = sst [smem:[#allocation30_spill]] %s1716_s25  ;;  %s1838_s25 = sld [smem:[#allocation4 + $0x3d]] }
  0x3e   :  { %v120_v60 = vrot.slane %v119_v52, 1  ;;  %v134_v61 = vrot.slane %v133_v53, 1  ;;  %v161_v62 = vadd.f32 %v160_v54, %v159_v46  ;;  %v175_v63 = vadd.f32 %v174_v55, %v173_v47  ;;  %3088 = sst [smem:[#allocation31_spill]] %s1718_s26  ;;  %s1966_s20 = sld [smem:[#allocation4 + $0x4b]] }
  0x3f   :  { %v1562_v6 = vadd.f32 %v106_v56, %v105_v48  ;;  %v148_v7 = vrot.slane %v147_v57, 1  ;;  %v188_v8 = vrot.slane %v187_v58, 2  ;;  %v247_v12 = vrot.slane %v246_v59, 2  ;;  %3089 = sst [smem:[#allocation32_spill]] %s1720_s27  ;;  %s1928_s27 = sld [smem:[#allocation4 + $0x5c]] }
  0x40   :  { %v1564_v13 = vadd.f32 %v120_v60, %v119_v52  ;;  %v1566_v16 = vadd.f32 %v134_v61, %v133_v53  ;;  %v162_v20 = vrot.slane %v161_v62, 1  ;;  %v176_v23 = vrot.slane %v175_v63, 1  ;;  %608 = vrot.lane.b32.xlu0 %v1544_v28, %s1418_s6  ;;  %3090 = sst [smem:[#allocation33_spill]] %s1722_s28 }
  0x41   :  { %v1570_v24 = vadd.f32 %v148_v7, %v147_v57  ;;  %v189_v25 = vadd.f32 %v188_v8, %v187_v58  ;;  %v248_v26 = vmax.f32 %v246_v59, %v247_v12  ;;  %v258_v27 = vsel %vm79_vm0, %v1509_v14, -inf  ;;  %3091 = sst [smem:[#allocation34_spill]] %s1724_s0  ;;  %s1746_s0 = sld [smem:[#allocation4 + $0x3]] }
  0x42   :  { %v1574_v29 = vadd.f32 %v162_v20, %v161_v62  ;;  %v1576_v30 = vadd.f32 %v176_v23, %v175_v63  ;;  %v259_v31 = vrot.slane %v258_v27, 4  ;;  %v272_v32 = vsel %vm79_vm0, %v1513_v15, -inf  ;;  %3092 = sst [smem:[#allocation35_spill]] %s1726_s29  ;;  %s1748_s29 = sld [smem:[#allocation4 + $0x4]] }
  0x43   :  { %v190_v33 = vrot.slane %v189_v25, 1  ;;  %v249_v34 = vrot.slane %v248_v26, 1  ;;  %v273_v35 = vrot.slane %v272_v32, 4  ;;  %v286_v36 = vsel %vm79_vm0, %v1518_v17, -inf  ;;  %3093 = sst [smem:[#allocation36_spill]] %s1728_s30  ;;  %s1750_s30 = sld [smem:[#allocation4 + $0x5]] }
  0x44   :  { %v260_v37 = vmax.f32 %v258_v27, %v259_v31  ;;  %v287_v38 = vrot.slane %v286_v36, 4  ;;  %v300_v39 = vsel %vm79_vm0, %v1522_v18, -inf  ;;  %v314_v14 = vsel %vm79_vm0, %v1526_v19, -inf  ;;  %661 = vrot.lane.b32.xlu0 %v1544_v28, %s1419_s7  ;;  %3094 = sst [smem:[#allocation37_spill]] %s1730_s3  ;;  %s1752_s3 = sld [smem:[#allocation4 + $0x6]] }
  0x45   :  { %v1588_v40 = vadd.f32 %v190_v33, %v189_v25  ;;  %v250_v15 = vmax.f32 %v248_v26, %v249_v34  ;;  %v274_v41 = vmax.f32 %v272_v32, %v273_v35  ;;  %v301_v42 = vrot.slane %v300_v39, 4  ;;  %3101 = sst [smem:[#allocation44_spill]] %s1744_s2  ;;  %s1772_s2 = sld [smem:[#allocation4 + $0x2c]] }
  0x46   :  { %v261_v43 = vrot.slane %v260_v37, 2  ;;  %v288_v44 = vmax.f32 %v286_v36, %v287_v38  ;;  %v315_v17 = vrot.slane %v314_v14, 4  ;;  %v328_v45 = vsel %vm79_vm0, %v1531_v21, -inf  ;;  %3134 = sst [smem:[#allocation68_spill]] %s1830_s23  ;;  %s1844_s23 = sld [smem:[#allocation4 + $0x3e]] }
  0x47   :  { %v275_v46 = vrot.slane %v274_v41, 2  ;;  %v302_v18 = vmax.f32 %v300_v39, %v301_v42  ;;  %v329_v47 = vrot.slane %v328_v45, 4  ;;  %v342_v19 = vsel %vm79_vm0, %v1535_v22, -inf  ;;  %3102 = sst [smem:[#allocation45_spill]] %s1746_s0  ;;  %s1764_s0 = sld [smem:[#allocation4 + $0x1a]] }
  0x48   :  { %v262_v48 = vmax.f32 %v260_v37, %v261_v43  ;;  %v289_v49 = vrot.slane %v288_v44, 2  ;;  %v316_v50 = vmax.f32 %v314_v14, %v315_v17  ;;  %v343_v51 = vrot.slane %v342_v19, 4  ;;  %714 = vrot.lane.b32.xlu0 %v1544_v28, %s1420_s8  ;;  %3103 = sst [smem:[#allocation46_spill]] %s1748_s29  ;;  %s1766_s29 = sld [smem:[#allocation4 + $0x1b]] }
  0x49   :  { %v276_v52 = vmax.f32 %v274_v41, %v275_v46  ;;  %v303_v53 = vrot.slane %v302_v18, 2  ;;  %v330_v54 = vmax.f32 %v328_v45, %v329_v47  ;;  %v87_v21 = vsel %vm79_vm0, %v1487_v9, 0.0  ;;  %3104 = sst [smem:[#allocation47_spill]] %s1750_s30  ;;  %s1770_s30 = sld [smem:[#allocation4 + $0x2b]] }
  0x4a   :  { %v263_v55 = vrot.slane %v262_v48, 1  ;;  %v290_v56 = vmax.f32 %v288_v44, %v289_v49  ;;  %v317_v57 = vrot.slane %v316_v50, 2  ;;  %v344_v58 = vmax.f32 %v342_v19, %v343_v51  ;;  %3105 = sst [smem:[#allocation48_spill]] %s1752_s3 }
  0x4b   :  { %v277_v59 = vrot.slane %v276_v52, 1  ;;  %v304_v22 = vmax.f32 %v302_v18, %v303_v53  ;;  %v331_v60 = vrot.slane %v330_v54, 2  ;;  %v88_v61 = vrot.slane %v87_v21, 4  ;;  %s1768_s3 = sld [smem:[#allocation4 + $0x2a]]  ;;  %3111 = sst [smem:[#allocation54_spill]] %s1772_s2 }
  0x4c   :  { %v264_v62 = vmax.f32 %v262_v48, %v263_v55  ;;  %v291_v63 = vrot.slane %v290_v56, 1  ;;  %v318_v7 = vmax.f32 %v316_v50, %v317_v57  ;;  %v345_v8 = vrot.slane %v344_v58, 2  ;;  %3149 = sst [smem:[#allocation72_spill]] %s1870_s21  ;;  %s1993_s2 = sld [smem:[#allocation4 + $0x53]] }
  0x4d   :  { %v278_v12 = vmax.f32 %v276_v52, %v277_v59  ;;  %v305_v20 = vrot.slane %v304_v22, 1  ;;  %v332_v23 = vmax.f32 %v330_v54, %v331_v60  ;;  %v89_v25 = vadd.f32 %v88_v61, %v87_v21  ;;  %3108 = sst [smem:[#allocation51_spill]] %s1764_s0  ;;  %s1780_s0 = sld [smem:[#allocation4 + $0x2f]] }
  0x4e   :  { %v292_v26 = vmax.f32 %v290_v56, %v291_v63  ;;  %v319_v27 = vrot.slane %v318_v7, 1  ;;  %v346_v31 = vmax.f32 %v344_v58, %v345_v8  ;;  %v372_v9 = vsel %vm208_vm1, %v264_v62, %v250_v15  ;;  %s3142_s28 = sld [smem:[#allocation51_spill]]  ;;  %s2020_s21 = sld [smem:[#allocation4 + $0x50]] }
  0x4f   :  { %v306_v32 = vmax.f32 %v304_v22, %v305_v20  ;;  %v333_v33 = vrot.slane %v332_v23, 1  ;;  %v373_v34 = vsel %vm210_vm2, %v278_v12, %v372_v9  ;;  %v90_v35 = vrot.slane %v89_v25, 2  ;;  %3110 = sst [smem:[#allocation53_spill]] %s1770_s30  ;;  %s1785_s30 = sld [smem:[#allocation4 + $0x31]] }
  0x50   :  { %v320_v36 = vmax.f32 %v318_v7, %v319_v27  ;;  %v347_v37 = vrot.slane %v346_v31, 1  ;;  %v374_v38 = vsel %vm212_vm3, %v292_v26, %v373_v34  ;;  %v237_v39 = vsel %vm79_vm0, %v1467_v0, -inf  ;;  %3163 = sst [smem:[#allocation82_spill]] %s1928_s27 }
  0x51   :  { %v334_v14 = vmax.f32 %v332_v23, %v333_v33  ;;  %v375_v41 = vsel %vm214_vm4, %v306_v32, %v374_v38  ;;  %v91_v42 = vadd.f32 %v90_v35, %v89_v25  ;;  %v238_v43 = vrot.slane %v237_v39, 4  ;;  %3109 = sst [smem:[#allocation52_spill]] %s1768_s3  ;;  %s1783_s3 = sld [smem:[#allocation4 + $0x30]] }
  0x52   :  { %v348_v44 = vmax.f32 %v346_v31, %v347_v37  ;;  %v376_v15 = vsel %vm216_vm5, %v320_v36, %v375_v41  ;;  %v251_v17 = vsel %vm79_vm0, %v1469_v1, -inf  ;;  %v265_v45 = vsel %vm79_vm0, %v1471_v2, -inf }
  0x53   :  { %v377_v46 = vsel %vm218_vm6, %v334_v14, %v376_v15  ;;  %v92_v18 = vrot.slane %v91_v42, 1  ;;  %v239_v47 = vmax.f32 %v237_v39, %v238_v43  ;;  %v252_v19 = vrot.slane %v251_v17, 4  ;;  %3114 = sst [smem:[#allocation57_spill]] %s1780_s0  ;;  %s2003_s0 = sld [smem:[#allocation4 + $0x60]] }
  0x54   :  { %v1611_v0 = vsel %vm220_vm7, %v348_v44, %v377_v46  ;;  %v266_v48 = vrot.slane %v265_v45, 4  ;;  %v279_v49 = vsel %vm79_vm0, %v1473_v3, -inf  ;;  %v293_v50 = vsel %vm79_vm0, %v1475_v4, -inf }
  0x55   :  { %769 = vrot.lane.b32.xlu1 %v1611_v0, %s1416_s4  ;;  %v93_v1 = vadd.f32 %v92_v18, %v91_v42  ;;  %v240_v2 = vrot.slane %v239_v47, 2  ;;  %v253_v51 = vmax.f32 %v251_v17, %v252_v19  ;;  %v280_v52 = vrot.slane %v279_v49, 4  ;;  %3116 = sst [smem:[#allocation59_spill]] %s1785_s30 }
  0x56   :  { %v267_v53 = vmax.f32 %v265_v45, %v266_v48  ;;  %v294_v54 = vrot.slane %v293_v50, 4  ;;  %v307_v21 = vsel %vm79_vm0, %v1477_v5, -inf  ;;  %v321_v55 = vsel %vm79_vm0, %v1489_v10, -inf  ;;  %s1802_s30 = sld [smem:[#allocation4 + $0x35]] }
  0x57   :  { %v222_v3 = vsel %vm208_vm1, %v1562_v6, %v93_v1  ;;  %v241_v56 = vmax.f32 %v239_v47, %v240_v2  ;;  %v254_v4 = vrot.slane %v253_v51, 2  ;;  %v281_v57 = vmax.f32 %v279_v49, %v280_v52  ;;  %3115 = sst [smem:[#allocation58_spill]] %s1783_s3  ;;  %s1960_s3 = sld [smem:[#allocation4 + $0x58]] }
  0x58   :  { %v223_v58 = vsel %vm210_vm2, %v1564_v13, %v222_v3  ;;  %v268_v59 = vrot.slane %v267_v53, 2  ;;  %v295_v22 = vmax.f32 %v293_v50, %v294_v54  ;;  %v308_v60 = vrot.slane %v307_v21, 4 }
  0x59   :  { %v224_v61 = vsel %vm212_vm3, %v1566_v16, %v223_v58  ;;  %v242_v62 = vrot.slane %v241_v56, 1  ;;  %v255_v5 = vmax.f32 %v253_v51, %v254_v4  ;;  %v282_v63 = vrot.slane %v281_v57, 2 }
  0x5a   :  { %v225_v10 = vsel %vm214_vm4, %v1570_v24, %v224_v61  ;;  %v269_v7 = vmax.f32 %v267_v53, %v268_v59  ;;  %v296_v6 = vrot.slane %v295_v22, 2  ;;  %v309_v8 = vmax.f32 %v307_v21, %v308_v60 }
  0x5b   :  { %v226_v12 = vsel %vm216_vm5, %v1574_v29, %v225_v10  ;;  %v243_v20 = vmax.f32 %v241_v56, %v242_v62  ;;  %v256_v13 = vrot.slane %v255_v5, 1  ;;  %v283_v23 = vmax.f32 %v281_v57, %v282_v63 }
  0x5c   :  { %v227_v25 = vsel %vm218_vm6, %v1576_v30, %v226_v12  ;;  %v270_v26 = vrot.slane %v269_v7, 1  ;;  %v297_v16 = vmax.f32 %v295_v22, %v296_v6  ;;  %v310_v27 = vrot.slane %v309_v8, 2  ;;  %3118 = sst [smem:[#allocation61_spill]] %s1802_s30  ;;  %s1975_s30 = sld [smem:[#allocation4 + $0x5f]] }
  0x5d   :  { %v228_v31 = vsel %vm220_vm7, %v1588_v40, %v227_v25  ;;  %v257_v9 = vmax.f32 %v255_v5, %v256_v13  ;;  %v284_v24 = vrot.slane %v283_v23, 1  ;;  %v322_v32 = vrot.slane %v321_v55, 4 }
  0x5e   :  { %v1637_v33 = vmul.f32 0.25, %v228_v31  ;;  %v271_v34 = vmax.f32 %v269_v7, %v270_v26  ;;  %v298_v35 = vrot.slane %v297_v16, 1  ;;  %v311_v29 = vmax.f32 %v309_v8, %v310_v27 }
  0x5f   :  { %v285_v36 = vmax.f32 %v283_v23, %v284_v24  ;;  %v323_v37 = vmax.f32 %v321_v55, %v322_v32  ;;  %v335_v38 = vsel %vm79_vm0, %v1491_v11, -inf  ;;  %v365_v30 = vsel %vm208_vm1, %v257_v9, %v243_v20 }
  0x60   :  { %462 = vrot.lane.b32.xlu1 %v1637_v33, %s1415_s1  ;;  %423 = vrot.lane.b32.xlu0 %v1637_v33, %s1416_s4  ;;  %v299_v40 = vmax.f32 %v297_v16, %v298_v35  ;;  %v312_v39 = vrot.slane %v311_v29, 1  ;;  %v336_v14 = vrot.slane %v335_v38, 4  ;;  %v366_v41 = vsel %vm210_vm2, %v271_v34, %v365_v30 }
  0x61   :  { %v324_v42 = vrot.slane %v323_v37, 2  ;;  %v367_v43 = vsel %vm212_vm3, %v285_v36, %v366_v41  ;;  %v394_v2 = vlaneseq  ;;  %v472_v52 = vstv %s1684_s9  ;;  %s1800_s9 = sld [smem:[#allocation4 + $0x34]] }
  0x62   :  { %v313_v44 = vmax.f32 %v311_v29, %v312_v39  ;;  %v337_v15 = vmax.f32 %v335_v38, %v336_v14  ;;  %v368_v11 = vsel %vm214_vm4, %v299_v40, %v367_v43  ;;  %v478_v54 = vstv %s1686_s10  ;;  %s1828_s10 = sld [smem:[#allocation4 + $0x3a]]  ;;  %3173 = sst [smem:[#allocation84_spill]] %s1975_s30 }
  0x63   :  { %v325_v17 = vmax.f32 %v323_v37, %v324_v42  ;;  %v1787_v53 = vand.u32 127, %v394_v2  ;;  %v484_v21 = vstv %s1688_s11  ;;  %v490_v55 = vstv %s1690_s12  ;;  %s1808_s12 = sld [smem:[#allocation4 + $0x36]]  ;;  %s1846_s11 = sld [smem:[#allocation4 + $0x42]] }
  0x64   :  { %515 = vrot.lane.b32.xlu1 %v1637_v33, %s1417_s5  ;;  %v338_v45 = vrot.slane %v337_v15, 2  ;;  %v369_v47 = vsel %vm216_vm5, %v313_v44, %v368_v11  ;;  %v496_v3 = vstv %s1692_s13  ;;  %v502_v56 = vstv %s1694_s14  ;;  %s1810_s13 = sld [smem:[#allocation4 + $0x37]]  ;;  %s1854_s14 = sld [smem:[#allocation4 + $0x40]] }
  0x65   :  { %v326_v46 = vrot.slane %v325_v17, 1  ;;  %3117 = vst [vmem:[#allocation60_spill] sm:$0xff] %v1787_v53  ;;  %v508_v4 = vstv %s1696_s15  ;;  %v3055_v57 = vstv %s1698_s16  ;;  %v3056_v58 = vstv %s1700_s17  ;;  %s1818_s17 = sld [smem:[#allocation4 + $0x38]]  ;;  %s1852_s15 = sld [smem:[#allocation4 + $0x3f]] }
  0x66   :  { %v339_v18 = vmax.f32 %v337_v15, %v338_v45  ;;  %v537_v59 = vstv %s1702_s18  ;;  %v3058_v22 = vstv %s1704_s19  ;;  %v1815_v5 = vadd.s32 128, %v1787_v53  ;;  %s1820_s19 = sld [smem:[#allocation4 + $0x39]]  ;;  %s1860_s18 = sld [smem:[#allocation4 + $0x4d]] }
  0x67   :  { %v327_v19 = vmax.f32 %v325_v17, %v326_v46  ;;  %v597_v40 = vstv %s3142_s28  ;;  %v603_v39 = vstv %s1766_s29  ;;  %s1896_s29 = sld [smem:[#allocation4 + $0x55]]  ;;  %s1912_s16 = sld [smem:[#allocation4 + $0x5b]]  ;;  %vm464_vm8 = vcmp.lt.s32.totalorder %v1787_v53, 32 }
  0x68   :  { %610 = vrot.lane.b32.xlu1 %v1637_v33, %s1418_s6  ;;  %v340_v48 = vrot.slane %v339_v18, 1  ;;  %3124 = vst [vmem:[#allocation64_spill] sm:$0xff] %v1815_v5  ;;  %3132 = sst [smem:[#allocation67_spill]] %s1828_s10  ;;  %v1901_v46 = vmul.f32 %v597_v40, %v1544_v28  ;;  %v1933_v2 = vmul.f32 %v603_v39, %v1637_v33  ;;  %vm467_vm9 = vcmp.ge.s32.totalorder %v1787_v53, 32  ;;  %s1986_s28 = sld [smem:[#allocation4 + $0x4c]] }
  0x69   :  { %v370_v49 = vsel %vm218_vm6, %v327_v19, %v369_v47  ;;  %3119 = sst [smem:[#allocation62_spill]] %s1808_s12  ;;  %s1914_s10 = sld [smem:[#allocation4 + $0x43]]  ;;  %vm425_vm10 = vcmp.lt.s32.totalorder %v1787_v53, 48  ;;  %v930_v41 = vstv %s1930_s22  ;;  %vm517_vm11 = vcmp.lt.s32.totalorder %v1787_v53, 16 }
  0x6a   :  { %v341_v50 = vmax.f32 %v339_v18, %v340_v48  ;;  %3121 = sst [smem:[#allocation63_spill]] %s1810_s13  ;;  %3155 = vst [vmem:[#allocation76_spill] sm:$0xff] %v1901_v46  ;;  %v1904_v18 = vmul.f32 %v603_v39, %v1544_v28  ;;  %s3164_s13 = sld [smem:[#allocation59_spill]]  ;;  %3165 = vst [vmem:[#allocation83_spill] sm:$0xff] %v1933_v2  ;;  %vm520_vm12 = vcmp.ge.s32.totalorder %v1787_v53, 16  ;;  %v2038_v38 = vmul.f32 %v930_v41, %v1611_v0 }
  0x6b   :  { %3126 = sst [smem:[#allocation65_spill]] %s1818_s17  ;;  %s3166_s27 = sld [smem:[#allocation63_spill]]  ;;  %v948_v16 = vstv %s1966_s20  ;;  %vm612_vm13 = vcmp.lt.s32.totalorder %v1787_v53, 112  ;;  %vm616_vm14 = vcmp.lt.s32.totalorder %v1815_v5, 240  ;;  %vm428_vm15 = vcmp.ge.s32.totalorder %v1787_v53, 48 }
  0x6c   :  { %663 = vrot.lane.b32.xlu1 %v1637_v33, %s1419_s7  ;;  %v1658_v1 = vsel %vm220_vm7, %v341_v50, %v370_v49  ;;  %3127 = sst [smem:[#allocation66_spill]] %s1820_s19  ;;  %s1836_s19 = sld [smem:[#allocation4 + $0x3c]]  ;;  %3156 = vst [vmem:[#allocation77_spill] sm:$0xff] %v1904_v18  ;;  %v1926_v50 = vmul.f32 %v597_v40, %v1637_v33  ;;  %3195 = vst [vmem:[#allocation95_spill] sm:$0xff] %v2038_v38  ;;  %vm665_vm0 = vcmp.lt.s32.totalorder %v1787_v53, 96  ;;  %vm669_vm1 = vcmp.lt.s32.totalorder %v1815_v5, 224 }
  0x6d   :  { %3070 = vst [vmem:[#allocation13_spill] sm:$0xff] %v1658_v1  ;;  %767 = vrot.lane.b32.xlu0 %v1658_v1, %s1416_s4  ;;  %s1734_s4 = sld [smem:[#allocation4 + $0x27]]  ;;  %3143 = sst [smem:[#allocation51_spill]] %s1846_s11  ;;  %v2034_v31 = vmul.f32 %v930_v41, %v1658_v1  ;;  %v2058_v13 = vmul.f32 %v948_v16, %v1658_v1  ;;  %vm718_vm2 = vcmp.lt.s32.totalorder %v1787_v53, 80  ;;  %vm722_vm3 = vcmp.lt.s32.totalorder %v1815_v5, 208 }
  0x6e   :  { %3146 = sst [smem:[#allocation70_spill]] %s1854_s14  ;;  %3162 = vst [vmem:[#allocation81_spill] sm:$0xff] %v1926_v50  ;;  %s1977_s12 = sld [smem:[#allocation4 + $0x52]] }
  0x6f   :  { %3152 = sst [smem:[#allocation74_spill]] %s1896_s29  ;;  %s1948_s29 = sld [smem:[#allocation4 + $0x44]]  ;;  %3194 = vst [vmem:[#allocation94_spill] sm:$0xff] %v2034_v31  ;;  %3198 = vst [vmem:[#allocation98_spill] sm:$0xff] %v2058_v13 }
  0x70   :  { %716 = vrot.lane.b32.xlu1 %v1637_v33, %s1420_s8  ;;  %3159 = sst [smem:[#allocation78_spill]] %s1912_s16  ;;  %s1946_s16 = sld [smem:[#allocation4 + $0x4a]] }
  0x71   :  { %817 = vrot.lane.b32.xlu0 %v1658_v1, %s1415_s1  ;;  %3160 = sst [smem:[#allocation79_spill]] %s1914_s10  ;;  %s1938_s10 = sld [smem:[#allocation4 + $0x56]] }
  0x72   :  { %3135 = sst [smem:[#allocation69_spill]] %s1836_s19  ;;  %s1984_s17 = sld [smem:[#allocation4 + $0x59]] }
  0x73   :  { %3096 = sst [smem:[#allocation39_spill]] %s1734_s4  ;;  %s1754_s4 = sld [smem:[#allocation4 + $0x15]] }
  0x74   :  { %819 = vrot.lane.b32.xlu1 %v1611_v0, %s1415_s1  ;;  %s1732_s1 = sld [smem:[#allocation4 + $0x26]]  ;;  %3174 = sst [smem:[#allocation85_spill]] %s1977_s12 }
  0x75   :  { %867 = vrot.lane.b32.xlu0 %v1658_v1, %s1417_s5  ;;  %3167 = sst [smem:[#allocation59_spill]] %s1948_s29  ;;  %s1995_s19 = sld [smem:[#allocation4 + $0x49]] }
  0x76   :  { %s1968_s29 = sld [smem:[#allocation4 + $0x45]]  ;;  %s2018_s22 = sld [smem:[#allocation4 + $0x5a]]  ;;  %v942_v32 = vstv %s1946_s16 }
  0x77   :  { %s3184_s11 = sld [smem:[#allocation82_spill]]  ;;  %s2026_s14 = sld [smem:[#allocation4 + $0x61]]  ;;  %v2052_v30 = vmul.f32 %v942_v32, %v1611_v0 }
  0x78   :  { %869 = vrot.lane.b32.xlu1 %v1611_v0, %s1417_s5  ;;  %s1736_s5 = sld [smem:[#allocation4 + $0x28]]  ;;  %3191 = sst [smem:[#allocation82_spill]] %s2020_s21 }
  0x79   :  { %959 = vrot.lane.b32.xlu0 %v1658_v1, %s1418_s6  ;;  %v567_v34 = vstv %s1754_s4  ;;  %s1868_s4 = sld [smem:[#allocation4 + $0x46]]  ;;  %3175 = sst [smem:[#allocation86_spill]] %s1984_s17  ;;  %3197 = vst [vmem:[#allocation97_spill] sm:$0xff] %v2052_v30 }
  0x7a   :  { %3095 = sst [smem:[#allocation38_spill]] %s1732_s1  ;;  %s1862_s1 = sld [smem:[#allocation4 + $0x41]]  ;;  %v1878_v44 = vmul.f32 %v567_v34, %v1544_v28  ;;  %v1907_v47 = vmul.f32 %v567_v34, %v1637_v33 }
  0x7b   :  { %v3051_v23 = vstv %s1995_s19  ;;  %s3213_s17 = sld [smem:[#allocation24_spill]]  ;;  %s3214_s16 = sld [smem:[#allocation25_spill]] }
  0x7c   :  { %961 = vrot.lane.b32.xlu1 %v1611_v0, %s1418_s6  ;;  %s1738_s6 = sld [smem:[#allocation4 + $0x29]]  ;;  %3172 = sst [smem:[#allocation63_spill]] %s1968_s29 }
  0x7d   :  { %1009 = vrot.lane.b32.xlu0 %v1658_v1, %s1419_s7  ;;  %3192 = sst [smem:[#allocation92_spill]] %s2026_s14  ;;  %s3210_s14 = sld [smem:[#allocation21_spill]] }
  0x7e   :  { %3097 = sst [smem:[#allocation40_spill]] %s1736_s5  ;;  %s1756_s5 = sld [smem:[#allocation4 + $0x16]] }
  0x7f   :  { %s3215_s20 = sld [smem:[#allocation26_spill]]  ;;  %s3218_s21 = sld [smem:[#allocation28_spill]] }
  0x80   :  { %1011 = vrot.lane.b32.xlu1 %v1611_v0, %s1419_s7  ;;  %s1740_s7 = sld [smem:[#allocation4]]  ;;  %3148 = sst [smem:[#allocation71_spill]] %s1862_s1 }
  0x81   :  { %1059 = vrot.lane.b32.xlu0 %v1658_v1, %s1420_s8  ;;  %s3222_s29 = sld [smem:[#allocation30_spill]]  ;;  %s3251_s1 = sld [smem:[#allocation39_spill]] }
  0x82   :  { %3098 = sst [smem:[#allocation41_spill]] %s1738_s6  ;;  %s1758_s6 = sld [smem:[#allocation4 + $0x17]] }
  0x83   :  { %s3249_s12 = sld [smem:[#allocation38_spill]]  ;;  %s3254_s30 = sld [smem:[#allocation40_spill]] }
  0x84   :  { %1061 = vrot.lane.b32.xlu1 %v1611_v0, %s1420_s8  ;;  %s1742_s8 = sld [smem:[#allocation4 + $0x1]]  ;;  %v573_v35 = vstv %s1756_s5  ;;  %s3178_s5 = sld [smem:[#allocation78_spill]] }
  0x85   :  { %v1885_v15 = vmul.f32 %v573_v35, %v1544_v28  ;;  %v1910_v19 = vmul.f32 %v573_v35, %v1637_v33  ;;  %3179 = sst [smem:[#allocation78_spill]] %s1995_s19  ;;  %v3228_v30 = vstv %s3215_s20  ;;  %v3233_v31 = vstv %s3218_s21  ;;  %s3234_s19 = sld [smem:[#allocation34_spill]] }
  0x86   :  { %3099 = sst [smem:[#allocation42_spill]] %s1740_s7  ;;  %s1760_s7 = sld [smem:[#allocation4 + $0x18]] }
  0x88   :  { %v579_v29 = vstv %s1758_s6  ;;  %s1898_s6 = sld [smem:[#allocation4 + $0x4f]] }
  0x89   :  { %v1888_v17 = vmul.f32 %v579_v29, %v1544_v28  ;;  %v1917_v48 = vmul.f32 %v579_v29, %v1637_v33  ;;  %v954_v29 = vstv %s1986_s28  ;;  %s3224_s28 = sld [smem:[#allocation42_spill]] }
  0x8a   :  { %3100 = sst [smem:[#allocation43_spill]] %s1742_s8  ;;  %s1762_s8 = sld [smem:[#allocation4 + $0x19]]  ;;  %v2077_v12 = vmul.f32 %v954_v29, %v1658_v1 }
  0x8b   :  { %s3259_s21 = sld [smem:[#allocation43_spill]] }
  0x8c   :  { %3106 = sst [smem:[#allocation49_spill]] %s1760_s7  ;;  %s1774_s7 = sld [smem:[#allocation4 + $0x2d]]  ;;  %3203 = vst [vmem:[#allocation100_spill] sm:$0xff] %v2077_v12 }
  0x8d   :  { %s3136_s24 = sld [smem:[#allocation49_spill]] }
  0x8e   :  { %3137 = sst [smem:[#allocation49_spill]] %s1838_s25  ;;  %s1958_s25 = sld [smem:[#allocation4 + $0x5d]] }
  0x8f   :  { %3154 = sst [smem:[#allocation75_spill]] %s1898_s6  ;;  %s1940_s6 = sld [smem:[#allocation4 + $0x51]] }
  0x90   :  { %3107 = sst [smem:[#allocation50_spill]] %s1762_s8  ;;  %s1778_s8 = sld [smem:[#allocation4 + $0x2e]] }
  0x91   :  { %s3138_s26 = sld [smem:[#allocation50_spill]] }
  0x92   :  { %3112 = sst [smem:[#allocation55_spill]] %s1774_s7  ;;  %s1792_s7 = sld [smem:[#allocation4 + $0x32]] }
  0x93   :  { %3141 = sst [smem:[#allocation50_spill]] %s1844_s23  ;;  %v585_v36 = vstv %s3136_s24  ;;  %s3180_s23 = sld [smem:[#allocation75_spill]] }
  0x94   :  { %s1880_s24 = sld [smem:[#allocation4 + $0x54]]  ;;  %v1891_v11 = vmul.f32 %v585_v36, %v1544_v28  ;;  %3183 = sst [smem:[#allocation75_spill]] %s2003_s0 }
  0x95   :  { %s3220_s0 = sld [smem:[#allocation29_spill]] }
  0x96   :  { %3113 = sst [smem:[#allocation56_spill]] %s1778_s8  ;;  %s1794_s8 = sld [smem:[#allocation4 + $0x33]] }
  0x97   :  { %v591_v37 = vstv %s3138_s26  ;;  %s1882_s26 = sld [smem:[#allocation4 + $0x47]] }
  0x98   :  { %v1894_v45 = vmul.f32 %v591_v37, %v1544_v28  ;;  %v1920_v28 = vmul.f32 %v585_v36, %v1637_v33  ;;  %v1923_v49 = vmul.f32 %v591_v37, %v1637_v33  ;;  %v918_v36 = vstv %s1868_s4  ;;  %s3176_s4 = sld [smem:[#allocation74_spill]] }
  0x99   :  { %3177 = sst [smem:[#allocation74_spill]] %s1993_s2  ;;  %v1998_v40 = vmul.f32 %v918_v36, %v1658_v1  ;;  %v2012_v34 = vmul.f32 %v918_v36, %v1611_v0  ;;  %v2045_v36 = vmul.f32 %v942_v32, %v1658_v1  ;;  %s3216_s2 = sld [smem:[#allocation27_spill]] }
  0x9a   :  { %3150 = vst [vmem:[#allocation73_spill] sm:$0xff] %v1894_v45  ;;  %3161 = vst [vmem:[#allocation80_spill] sm:$0xff] %v1923_v49 }
  0x9b   :  { %3181 = vst [vmem:[#allocation87_spill] sm:$0xff] %v1998_v40  ;;  %3187 = vst [vmem:[#allocation90_spill] sm:$0xff] %v2012_v34 }
  0x9c   :  { %3196 = vst [vmem:[#allocation96_spill] sm:$0xff] %v2045_v36 }
  0x9d   :  { %v924_v9 = vstv %s1882_s26  ;;  %s3182_s26 = sld [smem:[#allocation79_spill]] }
  0x9e   :  { %v2015_v37 = vmul.f32 %v924_v9, %v1658_v1  ;;  %3190 = sst [smem:[#allocation79_spill]] %s2018_s22  ;;  %v2031_v43 = vmul.f32 %v924_v9, %v1611_v0  ;;  %v2072_v9 = vmul.f32 %v948_v16, %v1611_v0  ;;  %s3211_s22 = sld [smem:[#allocation22_spill]] }
  0xa0   :  { %3188 = vst [vmem:[#allocation91_spill] sm:$0xff] %v2015_v37  ;;  %3193 = vst [vmem:[#allocation93_spill] sm:$0xff] %v2031_v43  ;;  %v3236_v43 = vstv %s3220_s0  ;;  %v3243_v37 = vmov %v3233_v31  ;;  %s3262_s0 = sld [smem:[#allocation44_spill]] }
  0xa1   :  { %3202 = vst [vmem:[#allocation99_spill] sm:$0xff] %v2072_v9  ;;  %v3226_v9 = vstv %s3214_s16 }
  0xaa   :  { %v1776_v51 = vpop.permute.xlu0 %421  ;;  %v1950_v33 = vpop.permute.xlu1 %460 }
  0xae   :  { %v1822_v10 = vpop.permute.xlu0 %513 }
  0xb2   :  { %v1872_v14 = vpop.permute.xlu0 %608 }
  0xb6   :  { %v1952_v39 = vpop.permute.xlu0 %661 }
  0xba   :  { %v2008_v42 = vpop.permute.xlu0 %714 }
  0xbb   :  { %3186 = vst [vmem:[#allocation89_spill] sm:$0xff] %v2008_v42 }
  0xc7   :  { %v2005_v35 = vpop.permute.xlu1 %769 }
  0xc8   :  { %3185 = vst [vmem:[#allocation88_spill] sm:$0xff] %v2005_v35 }
  0xd2   :  { %v463_v27 = vpop.permute.xlu1 %462  ;;  %v424_v26 = vpop.permute.xlu0 %423 }
  0xd3   :  { %v465_v32 = vsel %vm464_vm8, %v1950_v33, %v463_v27  ;;  %v466_v41 = vsel %vm464_vm8, %v463_v27, %v1950_v33  ;;  %v2085_v16 = vsel %vm425_vm10, %v1776_v51, %v424_v26  ;;  %v2089_v33 = vmul.f32 %v954_v29, %v1611_v0 }
  0xd4   :  { %v469_v25 = vsel %vm467_vm9, %v466_v41, 0.0  ;;  %v2094_v41 = vmul.f32 %v3051_v23, %v1611_v0  ;;  %v2098_v24 = vmul.f32 %v472_v52, %v465_v32  ;;  %v2102_v8 = vmul.f32 %v478_v54, %v465_v32 }
  0xd5   :  { %3206 = vst [vmem:[#allocation101_spill] sm:$0xff] %v2089_v33  ;;  %v2106_v20 = vmul.f32 %v484_v21, %v465_v32  ;;  %v427_v29 = vsel %vm425_vm10, %v424_v26, %v1776_v51  ;;  %v2113_v0 = vmul.f32 %v472_v52, %v469_v25  ;;  %v2117_v23 = vmul.f32 %v478_v54, %v469_v25 }
  0xd6   :  { %3208 = vst [vmem:[#allocation102_spill] sm:$0xff] %v2094_v41  ;;  %v516_v27 = vpop.permute.xlu1 %515  ;;  %v2121_v6 = vmul.f32 %v484_v21, %v469_v25  ;;  %v2128_v63 = vmul.f32 %v490_v55, %v469_v25  ;;  %v2132_v51 = vmul.f32 %v490_v55, %v465_v32  ;;  %v2136_v52 = vmul.f32 %v496_v3, %v469_v25 }
  0xd7   :  { %v518_v7 = vsel %vm517_vm11, %v1822_v10, %v516_v27  ;;  %v519_v54 = vsel %vm517_vm11, %v516_v27, %v1822_v10  ;;  %v2143_v21 = vmul.f32 %v496_v3, %v465_v32  ;;  %v2147_v26 = vmul.f32 %v502_v56, %v469_v25 }
  0xd8   :  { %v2151_v62 = vmul.f32 %v502_v56, %v465_v32  ;;  %v522_v55 = vsel %vm520_vm12, %v519_v54, 0.0  ;;  %v2158_v10 = vmul.f32 %v508_v4, %v469_v25  ;;  %v2162_v3 = vmul.f32 %v508_v4, %v465_v32 }
  0xd9   :  { %v2166_v27 = vmul.f32 %v3055_v57, %v518_v7  ;;  %v2170_v56 = vmul.f32 %v3056_v58, %v518_v7  ;;  %v2174_v61 = vmul.f32 %v537_v59, %v518_v7  ;;  %v2178_v60 = vmul.f32 %v3058_v22, %v518_v7 }
  0xda   :  { %v611_v54 = vpop.permute.xlu1 %610  ;;  %v3217_v25 = vstv %s3214_s16  ;;  %v3219_v32 = vstv %s3215_s20  ;;  %v3221_v41 = vstv %s3210_s14  ;;  %v3223_v33 = vstv %s3211_s22  ;;  %s3227_s14 = sld [smem:[#allocation31_spill]]  ;;  %s3229_s22 = sld [smem:[#allocation32_spill]] }
  0xdb   :  { %v2182_v4 = vmul.f32 %v3217_v25, %v518_v7  ;;  %v2186_v57 = vmul.f32 %v3219_v32, %v518_v7  ;;  %v2190_v58 = vmul.f32 %v3221_v41, %v522_v55  ;;  %v2194_v1 = vmul.f32 %v3223_v33, %v522_v55  ;;  %s3239_s16 = sld [smem:[#allocation35_spill]]  ;;  %s3242_s20 = sld [smem:[#allocation36_spill]] }
  0xdc   :  { %v613_v22 = vsel %vm612_vm13, %v1872_v14, %v611_v54  ;;  %v614_v25 = vsel %vm612_vm13, %v611_v54, %v1872_v14  ;;  %v2204_v32 = vmul.f32 %v537_v59, %v522_v55  ;;  %v3225_v41 = vstv %s3213_s17  ;;  %s3232_s17 = sld [smem:[#allocation33_spill]] }
  0xdd   :  { %v2208_v12 = vmul.f32 %v3225_v41, %v522_v55  ;;  %v2212_v33 = vmul.f32 %v3226_v9, %v522_v55  ;;  %v618_v13 = vsel %vm616_vm14, %v614_v25, 0.0  ;;  %v2218_v36 = vmul.f32 %v3228_v30, %v522_v55 }
  0xde   :  { %v3230_v14 = vstv %s3216_s2  ;;  %v664_v41 = vpop.permute.xlu1 %663  ;;  %v430_v9 = vsel %vm428_vm15, %v427_v29, 0.0  ;;  %v2232_v25 = vmul.f32 %v3233_v31, %v613_v22  ;;  %v2236_v30 = vmul.f32 %v3236_v43, %v613_v22  ;;  %s3244_s2 = sld [smem:[#allocation37_spill]] }
  0xdf   :  { %v2222_v54 = vmul.f32 %v3230_v14, %v522_v55  ;;  %v3231_v59 = vmov %v3230_v14  ;;  %v3238_v55 = vstv %s3222_s29  ;;  %v2247_v34 = vmul.f32 %v3243_v37, %v618_v13  ;;  %s3267_s29 = sld [smem:[#allocation45_spill]] }
  0xe0   :  { %v2226_v38 = vmul.f32 %v3231_v59, %v518_v7  ;;  %3235 = vst [vmem:[#allocation103_spill] sm:$0xff] %v2232_v25  ;;  %3237 = vst [vmem:[#allocation104_spill] sm:$0xff] %v2236_v30  ;;  %v2240_v14 = vmul.f32 %v3238_v55, %v613_v22  ;;  %v3241_v7 = vstv %s3224_s28  ;;  %v3246_v29 = vmov %v3236_v43 }
  0xe1   :  { %v435_v59 = vmul.f32 %v3241_v7, %v2085_v16  ;;  %3245 = vst [vmem:[#allocation106_spill] sm:$0xff] %v2247_v34  ;;  %v2251_v40 = vmul.f32 %v3246_v29, %v618_v13  ;;  %v3248_v31 = vmov %v3238_v55  ;;  %v2260_v43 = vsel %vm665_vm0, %v1952_v39, %v664_v41 }
  0xe2   :  { %3240 = vst [vmem:[#allocation105_spill] sm:$0xff] %v2240_v14  ;;  %v2255_v35 = vmul.f32 %v3248_v31, %v618_v13  ;;  %3252 = vst [vmem:[#allocation109_spill] sm:$0xff] %v2260_v43  ;;  %v3253_v55 = vstv %s3227_s14  ;;  %v3258_v29 = vstv %s3229_s22  ;;  %v667_v31 = vsel %vm665_vm0, %v664_v41, %v1952_v39  ;;  %s3272_s14 = sld [smem:[#allocation46_spill]]  ;;  %s3277_s22 = sld [smem:[#allocation47_spill]] }
  0xe3   :  { %3247 = vst [vmem:[#allocation107_spill] sm:$0xff] %v2251_v40  ;;  %v2264_v7 = vmul.f32 %v3253_v55, %v613_v22  ;;  %v3256_v42 = vmov %v3253_v55  ;;  %v2272_v14 = vmul.f32 %v3258_v29, %v613_v22  ;;  %v3264_v30 = vstv %s3232_s17  ;;  %s3281_s17 = sld [smem:[#allocation48_spill]] }
  0xe4   :  { %3250 = vst [vmem:[#allocation108_spill] sm:$0xff] %v2255_v35  ;;  %v2268_v37 = vmul.f32 %v3256_v42, %v618_v13  ;;  %v3261_v35 = vmov %v3258_v29  ;;  %v2283_v55 = vmul.f32 %v3264_v30, %v613_v22  ;;  %v3266_v34 = vmov %v3264_v30 }
  0xe5   :  { %3255 = vst [vmem:[#allocation110_spill] sm:$0xff] %v2264_v7  ;;  %3260 = vst [vmem:[#allocation112_spill] sm:$0xff] %v2272_v14  ;;  %v2279_v40 = vmul.f32 %v3261_v35, %v618_v13  ;;  %v2287_v42 = vmul.f32 %v3266_v34, %v618_v13  ;;  %v3274_v39 = vstv %s3239_s16  ;;  %v3276_v41 = vstv %s3242_s20 }
  0xe6   :  { %3257 = vst [vmem:[#allocation111_spill] sm:$0xff] %v2268_v37  ;;  %3265 = vst [vmem:[#allocation114_spill] sm:$0xff] %v2283_v55  ;;  %v3269_v37 = vstv %s3234_s19  ;;  %v2300_v35 = vmul.f32 %v3274_v39, %v2260_v43  ;;  %v2305_v30 = vmul.f32 %v3276_v41, %v2260_v43  ;;  %v3279_v34 = vstv %s3244_s2  ;;  %s3340_s19 = sld [smem:[#allocation54_spill]] }
  0xe7   :  { %3263 = vst [vmem:[#allocation113_spill] sm:$0xff] %v2279_v40  ;;  %3268 = vst [vmem:[#allocation115_spill] sm:$0xff] %v2287_v42  ;;  %v2291_v29 = vmul.f32 %v3269_v37, %v613_v22  ;;  %v3271_v14 = vmov %v3269_v37  ;;  %v2310_v42 = vmul.f32 %v3279_v34, %v2260_v43  ;;  %v2314_v22 = vsel %vm669_vm1, %v667_v31, 0.0 }
  0xe8   :  { %v2295_v7 = vmul.f32 %v3271_v14, %v618_v13  ;;  %3275 = vst [vmem:[#allocation118_spill] sm:$0xff] %v2300_v35  ;;  %3278 = vst [vmem:[#allocation119_spill] sm:$0xff] %v2305_v30  ;;  %v3282_v13 = vstv %s3249_s12  ;;  %v3284_v37 = vstv %s3251_s1  ;;  %v3286_v41 = vstv %s3254_s30 }
  0xe9   :  { %3270 = vst [vmem:[#allocation116_spill] sm:$0xff] %v2291_v29  ;;  %3280 = vst [vmem:[#allocation120_spill] sm:$0xff] %v2310_v42  ;;  %v2319_v14 = vmul.f32 %v3282_v13, %v2260_v43  ;;  %v2324_v39 = vmul.f32 %v3284_v37, %v2260_v43  ;;  %v2329_v30 = vmul.f32 %v3286_v41, %v2260_v43  ;;  %v3288_v34 = vstv %s3224_s28  ;;  %s3339_s28 = sld [smem:[#allocation53_spill]] }
  0xea   :  { %3273 = vst [vmem:[#allocation117_spill] sm:$0xff] %v2295_v7  ;;  %v434_v42 = vmul.f32 %v3288_v34, %v430_v9  ;;  %v3289_v35 = vstv %s3259_s21  ;;  %v3291_v55 = vstv %s3262_s0  ;;  %v3293_v25 = vstv %s3267_s29  ;;  %s3363_s21 = sld [smem:[#allocation61_spill]]  ;;  %s3367_s0 = sld [smem:[#allocation62_spill]] }
  0xeb   :  { %3283 = vst [vmem:[#allocation121_spill] sm:$0xff] %v2319_v14  ;;  %3285 = vst [vmem:[#allocation122_spill] sm:$0xff] %v2324_v39  ;;  %v438_v31 = vmul.f32 %v3289_v35, %v430_v9  ;;  %v3290_v7 = vmov %v3289_v35  ;;  %v442_v13 = vmul.f32 %v3291_v55, %v430_v9  ;;  %v3292_v14 = vmov %v3291_v55  ;;  %s3370_s29 = sld [smem:[#allocation68_spill]] }
  0xec   :  { %3287 = vst [vmem:[#allocation123_spill] sm:$0xff] %v2329_v30  ;;  %v439_v29 = vmul.f32 %v3290_v7, %v2085_v16  ;;  %v443_v40 = vmul.f32 %v3292_v14, %v2085_v16  ;;  %v446_v37 = vmul.f32 %v3293_v25, %v430_v9  ;;  %v3294_v39 = vmov %v3293_v25 }
  0xed   :  { %v447_v2 = vmul.f32 %v3294_v39, %v2085_v16  ;;  %v3295_v41 = vstv %s3272_s14  ;;  %v3297_v18 = vstv %s3277_s22  ;;  %v3299_v46 = vstv %s3281_s17  ;;  %s3371_s14 = sld [smem:[#allocation65_spill]]  ;;  %s3399_s22 = sld [smem:[#allocation72_spill]] }
  0xee   :  { %v450_v30 = vmul.f32 %v3295_v41, %v430_v9  ;;  %v3296_v34 = vmov %v3295_v41  ;;  %v454_v35 = vmul.f32 %v3297_v18, %v430_v9  ;;  %v3298_v50 = vmov %v3297_v18  ;;  %s3406_s17 = sld [smem:[#allocation71_spill]] }
  0xef   :  { %v451_v43 = vmul.f32 %v3296_v34, %v2085_v16  ;;  %v455_v7 = vmul.f32 %v3298_v50, %v2085_v16  ;;  %v458_v55 = vmul.f32 %v3299_v46, %v430_v9  ;;  %v3300_v49 = vstv %s3239_s16  ;;  %s3343_s16 = sld [smem:[#allocation56_spill]] }
  0xf0   :  { %v2363_v14 = vmul.f32 %v3300_v49, %v2314_v22  ;;  %v3302_v25 = vmov %v3299_v46  ;;  %v475_v41 = vadd.f32 %v2113_v0, %v434_v42  ;;  %v476_v45 = vadd.f32 %v2098_v24, %v435_v59 }
  0xf1   :  { %v459_v39 = vmul.f32 %v3302_v25, %v2085_v16  ;;  %v3303_v34 = vstv %s3242_s20  ;;  %v481_v50 = vadd.f32 %v2117_v23, %v438_v31  ;;  %v482_v46 = vadd.f32 %v2102_v8, %v439_v29  ;;  %s3344_s20 = sld [smem:[#allocation57_spill]] }
  0xf2   :  { %3301 = vst [vmem:[#allocation124_spill] sm:$0xff] %v2363_v14  ;;  %v2373_v18 = vmul.f32 %v3303_v34, %v2314_v22  ;;  %v493_v9 = vadd.f32 %v2128_v63, %v446_v37  ;;  %v487_v49 = vadd.f32 %v2121_v6, %v442_v13  ;;  %v488_v14 = vadd.f32 %v2106_v20, %v443_v40  ;;  %v3309_v13 = vld [vmem:[#allocation73_spill] sm:$0xff]  ;;  %v3310_v37 = vld [vmem:[#allocation80_spill] sm:$0xff] }
  0xf3   :  { %v494_v16 = vadd.f32 %v2132_v51, %v447_v2  ;;  %v499_v0 = vadd.f32 %v2136_v52, %v450_v30  ;;  %v500_v24 = vadd.f32 %v2143_v21, %v451_v43  ;;  %v505_v59 = vadd.f32 %v2147_v26, %v454_v35  ;;  %v717_v21 = vpop.permute.xlu1 %716  ;;  %v2398_v26 = vpop.permute.xlu0 %767 }
  0xf4   :  { %v506_v42 = vadd.f32 %v2151_v62, %v455_v7  ;;  %v511_v23 = vadd.f32 %v2158_v10, %v458_v55  ;;  %v3304_v8 = vstv %s3244_s2  ;;  %v512_v6 = vadd.f32 %v2162_v3, %v459_v39  ;;  %v3314_v39 = vld [vmem:[#allocation83_spill] sm:$0xff]  ;;  %s3355_s2 = sld [smem:[#allocation58_spill]] }
  0xf5   :  { %v2389_v63 = vmul.f32 %v3304_v8, %v2314_v22  ;;  %v528_v20 = vadd.f32 %v2190_v58, %v475_v41  ;;  %v529_v2 = vadd.f32 %v2166_v27, %v476_v45  ;;  %v534_v40 = vadd.f32 %v2194_v1, %v481_v50  ;;  %v3322_v8 = vld [vmem:[#allocation107_spill] sm:$0xff] }
  0xf6   :  { %v535_v51 = vadd.f32 %v2170_v56, %v482_v46  ;;  %v546_v52 = vadd.f32 %v2208_v12, %v493_v9  ;;  %v547_v62 = vadd.f32 %v2178_v60, %v494_v16  ;;  %v3305_v10 = vstv %s3249_s12  ;;  %s3307_s12 = sld [smem:[#allocation41_spill]]  ;;  %v3317_v46 = vld [vmem:[#allocation111_spill] sm:$0xff] }
  0xf7   :  { %v693_v43 = vmul.f32 %v3305_v10, %v2314_v22  ;;  %v540_v3 = vadd.f32 %v2204_v32, %v487_v49  ;;  %v541_v58 = vadd.f32 %v2174_v61, %v488_v14  ;;  %v552_v45 = vadd.f32 %v2212_v33, %v499_v0  ;;  %v2432_v25 = vpop.permute.xlu1 %819  ;;  %v3318_v49 = vld [vmem:[#allocation109_spill] sm:$0xff]  ;;  %v3326_v10 = vld [vmem:[#allocation112_spill] sm:$0xff] }
  0xf8   :  { %v553_v1 = vadd.f32 %v2182_v4, %v500_v24  ;;  %v558_v12 = vadd.f32 %v2218_v36, %v505_v59  ;;  %v559_v60 = vadd.f32 %v2186_v57, %v506_v42  ;;  %v564_v27 = vadd.f32 %v2222_v54, %v511_v23  ;;  %v3320_v24 = vld [vmem:[#allocation106_spill] sm:$0xff]  ;;  %v3321_v42 = vld [vmem:[#allocation104_spill] sm:$0xff] }
  0xf9   :  { %v3306_v56 = vstv %s3251_s1  ;;  %v565_v32 = vadd.f32 %v2226_v38, %v512_v6  ;;  %v570_v61 = vadd.f32 %v1878_v44, %v528_v20  ;;  %v588_v30 = vadd.f32 %v1891_v11, %v546_v52  ;;  %v3325_v52 = vld [vmem:[#allocation108_spill] sm:$0xff]  ;;  %s3337_s1 = sld [smem:[#allocation52_spill]] }
  0xfa   :  { %v699_v29 = vmul.f32 %v3306_v56, %v2314_v22  ;;  %v571_v33 = vadd.f32 %v1907_v47, %v529_v2  ;;  %v576_v4 = vadd.f32 %v1885_v15, %v534_v40  ;;  %v577_v36 = vadd.f32 %v1910_v19, %v535_v51  ;;  %v3311_v47 = vld [vmem:[#allocation76_spill] sm:$0xff]  ;;  %v3312_v15 = vld [vmem:[#allocation81_spill] sm:$0xff]  ;;  %v3313_v19 = vld [vmem:[#allocation77_spill] sm:$0xff] }
  0xfb   :  { %v589_v57 = vadd.f32 %v1920_v28, %v547_v62  ;;  %v3308_v54 = vstv %s3254_s30  ;;  %v582_v38 = vadd.f32 %v1888_v17, %v540_v3  ;;  %v583_v44 = vadd.f32 %v1917_v48, %v541_v58  ;;  %v2434_v28 = vpop.permute.xlu0 %817  ;;  %v3315_v17 = vld [vmem:[#allocation103_spill] sm:$0xff]  ;;  %v3316_v48 = vld [vmem:[#allocation110_spill] sm:$0xff]  ;;  %v3324_v40 = vld [vmem:[#allocation105_spill] sm:$0xff]  ;;  %s3334_s30 = sld [smem:[#allocation55_spill]] }
  0xfc   :  { %v705_v31 = vmul.f32 %v3308_v54, %v2314_v22  ;;  %v594_v11 = vadd.f32 %v3309_v13, %v552_v45  ;;  %v595_v35 = vadd.f32 %v3310_v37, %v553_v1  ;;  %v600_v7 = vadd.f32 %v3311_v47, %v558_v12  ;;  %v3327_v58 = vld [vmem:[#allocation113_spill] sm:$0xff]  ;;  %v3328_v1 = vld [vmem:[#allocation114_spill] sm:$0xff]  ;;  %v3335_v54 = vld [vmem:[#allocation124_spill] sm:$0xff]  ;;  %v2465_v47 = vpop.permute.xlu1 %869 }
  0xfd   :  { %v601_v55 = vadd.f32 %v3312_v15, %v559_v60  ;;  %v606_v14 = vadd.f32 %v3313_v19, %v564_v27  ;;  %v607_v41 = vadd.f32 %v3314_v39, %v565_v32  ;;  %v623_v34 = vadd.f32 %v3315_v17, %v570_v61  ;;  %v3329_v60 = vld [vmem:[#allocation115_spill] sm:$0xff]  ;;  %v3330_v56 = vld [vmem:[#allocation121_spill] sm:$0xff]  ;;  %v3331_v61 = vld [vmem:[#allocation116_spill] sm:$0xff] }
  0xfe   :  { %v641_v50 = vadd.f32 %v3316_v48, %v588_v30  ;;  %v642_v9 = vadd.f32 %v3317_v46, %v589_v57  ;;  %v3319_v16 = vstv %s3307_s12  ;;  %v624_v59 = vadd.f32 %v3320_v24, %v571_v33  ;;  %v3332_v33 = vld [vmem:[#allocation117_spill] sm:$0xff]  ;;  %v3338_v37 = vld [vmem:[#allocation89_spill] sm:$0xff]  ;;  %v3341_v15 = vld [vmem:[#allocation120_spill] sm:$0xff]  ;;  %s3455_s12 = sld [smem:[#allocation74_spill]] }
  0xff   :  { %v710_v0 = vmul.f32 %v3319_v16, %v3318_v49  ;;  %v629_v23 = vadd.f32 %v3321_v42, %v576_v4  ;;  %v630_v6 = vadd.f32 %v3322_v8, %v577_v36  ;;  %v3323_v20 = vmov %v3319_v16  ;;  %v3333_v36 = vld [vmem:[#allocation118_spill] sm:$0xff] }
 0x100   :  { %v711_v2 = vmul.f32 %v3323_v20, %v2314_v22  ;;  %v635_v51 = vadd.f32 %v3324_v40, %v582_v38  ;;  %v636_v62 = vadd.f32 %v3325_v52, %v583_v44  ;;  %v647_v3 = vadd.f32 %v3326_v10, %v594_v11  ;;  %v3336_v44 = vld [vmem:[#allocation119_spill] sm:$0xff]  ;;  %v3342_v19 = vld [vmem:[#allocation122_spill] sm:$0xff] }
 0x101   :  { %v648_v45 = vadd.f32 %v3327_v58, %v595_v35  ;;  %v653_v12 = vadd.f32 %v3328_v1, %v600_v7  ;;  %v654_v27 = vadd.f32 %v3329_v60, %v601_v55  ;;  %v694_v32 = vadd.f32 %v3330_v56, %v641_v50  ;;  %v2467_v7 = vpop.permute.xlu0 %867  ;;  %v962_v1 = vpop.permute.xlu1 %961 }
 0x102   :  { %v659_v30 = vadd.f32 %v3331_v61, %v606_v14  ;;  %v660_v4 = vadd.f32 %v3332_v33, %v607_v41  ;;  %v676_v22 = vadd.f32 %v3333_v36, %v623_v34  ;;  %v695_v57 = vadd.f32 %v693_v43, %v642_v9  ;;  %v3345_v41 = vld [vmem:[#allocation123_spill] sm:$0xff]  ;;  %v3359_v36 = vld [vmem:[#allocation88_spill] sm:$0xff] }
 0x103   :  { %v677_v38 = vadd.f32 %v3335_v54, %v624_v59  ;;  %v682_v13 = vadd.f32 %v3336_v44, %v629_v23  ;;  %v683_v11 = vadd.f32 %v2373_v18, %v630_v6  ;;  %v719_v35 = vsel %vm718_vm2, %v3338_v37, %v717_v21 }
 0x104   :  { %v688_v43 = vadd.f32 %v3341_v15, %v635_v51  ;;  %v689_v55 = vadd.f32 %v2389_v63, %v636_v62  ;;  %v700_v14 = vadd.f32 %v3342_v19, %v647_v3  ;;  %v720_v18 = vsel %vm718_vm2, %v717_v21, %v3338_v37 }
 0x105   :  { %v701_v39 = vadd.f32 %v699_v29, %v648_v45  ;;  %v706_v17 = vadd.f32 %v3345_v41, %v653_v12  ;;  %v724_v34 = vsel %vm722_vm3, %v720_v18, 0.0  ;;  %v3346_v48 = vstv %s3334_s30  ;;  %v960_v12 = vpop.permute.xlu0 %959  ;;  %s3456_s30 = sld [smem:[#allocation51_spill]] }
 0x106   :  { %v745_v50 = vmul.f32 %v3346_v48, %v719_v35  ;;  %v707_v46 = vadd.f32 %v705_v31, %v654_v27  ;;  %v712_v63 = vadd.f32 %v710_v0, %v659_v30  ;;  %v713_v9 = vadd.f32 %v711_v2, %v660_v4 }
 0x107   :  { %v3347_v49 = vstv %s3337_s1  ;;  %v3348_v24 = vstv %s3339_s28  ;;  %v3349_v42 = vstv %s3340_s19  ;;  %v3350_v21 = vmov %v3346_v48  ;;  %s1424_s1 = smov 127   ;;  %s3459_s28 = sld [smem:[#allocation78_spill]] }
 0x108   :  { %v727_v16 = vmul.f32 %v3347_v49, %v719_v35  ;;  %v733_v59 = vmul.f32 %v3348_v24, %v719_v35  ;;  %v739_v23 = vmul.f32 %v3349_v42, %v719_v35  ;;  %v746_v29 = vmul.f32 %v3350_v21, %v724_v34  ;;  %s3461_s19 = sld [smem:[#allocation79_spill]] }
 0x109   :  { %v747_v8 = vadd.f32 %v745_v50, %v694_v32  ;;  %v3351_v6 = vmov %v3347_v49  ;;  %v3352_v40 = vmov %v3348_v24  ;;  %v3353_v52 = vstv %s3343_s16  ;;  %v1012_v24 = vpop.permute.xlu1 %1011  ;;  %s3462_s16 = sld [smem:[#allocation92_spill]] }
 0x10a   :  { %v728_v20 = vmul.f32 %v3351_v6, %v724_v34  ;;  %v734_v51 = vmul.f32 %v3352_v40, %v724_v34  ;;  %v751_v62 = vmul.f32 %v3353_v52, %v719_v35  ;;  %v3354_v31 = vstv %s3344_s20  ;;  %s3473_s20 = sld [smem:[#allocation82_spill]] }
 0x10b   :  { %v757_v0 = vmul.f32 %v3354_v31, %v719_v35  ;;  %v2496_v2 = vadd.f32 %v727_v16, %v676_v22  ;;  %v2498_v10 = vadd.f32 %v733_v59, %v682_v13  ;;  %v3356_v3 = vmov %v3349_v42  ;;  %v1010_v59 = vpop.permute.xlu0 %1009 }
 0x10c   :  { %v740_v58 = vmul.f32 %v3356_v3, %v724_v34  ;;  %v748_v45 = vadd.f32 %v746_v29, %v695_v57  ;;  %v2502_v60 = vadd.f32 %v728_v20, %v677_v38  ;;  %v2504_v27 = vadd.f32 %v734_v51, %v683_v11 }
 0x10d   :  { %v2506_v56 = vadd.f32 %v739_v23, %v688_v43  ;;  %v3357_v32 = vmov %v3353_v52  ;;  %v2510_v30 = vadd.f32 %v751_v62, %v700_v14  ;;  %v3358_v33 = vmov %v3354_v31 }
 0x10e   :  { %v752_v61 = vmul.f32 %v3357_v32, %v724_v34  ;;  %v758_v4 = vmul.f32 %v3358_v33, %v724_v34  ;;  %v771_v22 = vsel %vm425_vm10, %v2398_v26, %v3359_v36  ;;  %v772_v57 = vsel %vm425_vm10, %v3359_v36, %v2398_v26 }
 0x10f   :  { %v2522_v54 = vadd.f32 %v740_v58, %v689_v55  ;;  %v2524_v38 = vadd.f32 %v757_v0, %v706_v17  ;;  %v3360_v44 = vstv %s3355_s2  ;;  %v773_v11 = vsel %vm428_vm15, %v772_v57, 0.0  ;;  %s1425_s2 = smov 126  }
 0x110   :  { %v763_v13 = vmul.f32 %v3360_v44, %v719_v35  ;;  %v2530_v37 = vadd.f32 %v752_v61, %v701_v39  ;;  %v2532_v15 = vadd.f32 %v758_v4, %v707_v46  ;;  %v3361_v43 = vmov %v3360_v44 }
 0x111   :  { %v764_v19 = vmul.f32 %v3361_v43, %v724_v34  ;;  %v3362_v14 = vstv %s1800_s9  ;;  %v3364_v55 = vstv %s3164_s13  ;;  %v3365_v35 = vstv %s1792_s7  ;;  %s3373_s9 = sld [smem:[#allocation66_spill]]  ;;  %s3374_s13 = sld [smem:[#allocation67_spill]] }
 0x112   :  { %v795_v18 = vmul.f32 %v3362_v14, %v773_v11  ;;  %v2538_v26 = vadd.f32 %v763_v13, %v712_v63  ;;  %v778_v41 = vmul.f32 %v3364_v55, %v771_v22  ;;  %v2544_v17 = vmul.f32 %v3365_v35, %v771_v22  ;;  %s3382_s7 = sld [smem:[#allocation69_spill]] }
 0x113   :  { %v3366_v48 = vmov %v3362_v14  ;;  %v2548_v50 = vadd.f32 %v764_v19, %v713_v9  ;;  %v3368_v46 = vmov %v3364_v55  ;;  %v3369_v49 = vstv %s1794_s8  ;;  %s3386_s8 = sld [smem:[#allocation49_spill]] }
 0x114   :  { %v796_v39 = vmul.f32 %v3366_v48, %v771_v22  ;;  %v777_v34 = vmul.f32 %v3368_v46, %v773_v11  ;;  %v2554_v16 = vmul.f32 %v3369_v49, %v771_v22  ;;  %v797_v63 = vadd.f32 %v795_v18, %v747_v8 }
 0x115   :  { %v3372_v42 = vmov %v3365_v35  ;;  %v2562_v9 = vsel %vm464_vm8, %v2434_v28, %v2432_v25  ;;  %v822_v29 = vsel %vm464_vm8, %v2432_v25, %v2434_v28  ;;  %v3375_v8 = vmov %v3369_v49 }
 0x116   :  { %v783_v23 = vmul.f32 %v3372_v42, %v773_v11  ;;  %v798_v21 = vadd.f32 %v796_v39, %v748_v45  ;;  %v789_v6 = vmul.f32 %v3375_v8, %v773_v11  ;;  %v3376_v20 = vstv %s3363_s21  ;;  %v1060_v8 = vpop.permute.xlu0 %1059  ;;  %s1426_s21 = smov 125  }
 0x117   :  { %v2572_v40 = vmul.f32 %v3376_v20, %v773_v11  ;;  %v3377_v51 = vmov %v3376_v20  ;;  %v2580_v62 = vsel %vm467_vm9, %v822_v29, 0.0  ;;  %v3378_v31 = vstv %s3367_s0  ;;  %v1062_v29 = vpop.permute.xlu1 %1061  ;;  %s1427_s0 = smov [#allocation9]  }
 0x118   :  { %v2576_v52 = vmul.f32 %v3377_v51, %v771_v22  ;;  %v2584_v0 = vmul.f32 %v3378_v31, %v773_v11  ;;  %v3379_v3 = vmov %v3378_v31  ;;  %v3380_v25 = vstv %s3166_s27  ;;  %s3396_s27 = sld [smem:[#allocation70_spill]] }
 0x119   :  { %v2588_v58 = vmul.f32 %v3379_v3, %v771_v22  ;;  %v2592_v28 = vmul.f32 %v3380_v25, %v773_v11  ;;  %v3381_v45 = vstv %s3370_s29  ;;  %v3383_v61 = vmov %v3380_v25  ;;  %s1209_s29 = sshll.u32 %s1427_s0, 4  ;;  %s1210_s29 = int_to_ptr.vmem [resolvable:$true] %s1209_s29 }
 0x11a   :  { %v845_v32 = vmul.f32 %v3381_v45, %v2580_v62  ;;  %v2599_v33 = vmul.f32 %v3383_v61, %v771_v22  ;;  %v3384_v4 = vstv %s3371_s14  ;;  %v3385_v57 = vmov %v3381_v45  ;;  %s1383_s14 = scalar_lea.vmem %s1210_s29, 256  ;;  %p1388_p12 = scmp.lt.s32.totalorder %s1210_s29, %s1210_s29 }
 0x11b   :  { %v828_v36 = vmul.f32 %v3384_v4, %v2562_v9  ;;  %v846_v44 = vmul.f32 %v3385_v57, %v2562_v9  ;;  %v2611_v13 = vsel %vm517_vm11, %v2467_v7, %v2465_v47  ;;  %v3387_v11 = vmov %v3384_v4  ;;  %p1384_p11 = scmp.ne.s32.totalorder %s1210_s29, %s1383_s14  ;;  %p1389_p13 = scmp.lt.s32.totalorder %s1383_s14, %s1383_s14 }
 0x11c   :  { %v827_v43 = vmul.f32 %v3387_v11, %v2580_v62  ;;  %v3388_v19 = vstv %s3373_s9  ;;  %v3389_v14 = vstv %s3374_s13  ;;  %v2624_v55 = vadd.f32 %v845_v32, %v797_v63 }
 0x11d   :  { %v834_v22 = vmul.f32 %v3388_v19, %v2562_v9  ;;  %v2622_v18 = vmul.f32 %v3389_v14, %v2562_v9  ;;  %v3390_v35 = vmov %v3388_v19  ;;  %v3391_v39 = vmov %v3389_v14  ;;  %p1390_p0 = por %p1389_p13, %p1388_p12 }
 0x11e   :  { %v833_v48 = vmul.f32 %v3390_v35, %v2580_v62  ;;  %v839_v46 = vmul.f32 %v3391_v39, %v2580_v62  ;;  %v2632_v49 = vadd.f32 %v846_v44, %v798_v21  ;;  %v872_v42 = vsel %vm517_vm11, %v2465_v47, %v2467_v7 }
 0x11f   :  { %v3392_v20 = vstv %s3382_s7  ;;  %v964_v21 = vsel %vm612_vm13, %v962_v1, %v960_v12  ;;  %v1014_v3 = vsel %vm665_vm0, %v1012_v24, %v1010_v59  ;;  %v3394_v47 = vstv %s3386_s8  ;;  %p1391_p1 = pnand %p1390_p0, %p1384_p11 }
 0x120   :  { %v2641_v51 = vmul.f32 %v3392_v20, %v2580_v62  ;;  %v3393_v63 = vmov %v3392_v20  ;;  %v2655_v7 = vmul.f32 %v3394_v47, %v2580_v62  ;;  %v2659_v25 = vsel %vm520_vm12, %v872_v42, 0.0 }
 0x121   :  { %v2646_v31 = vmul.f32 %v3393_v63, %v2562_v9  ;;  %v2663_v45 = vsel %vm612_vm13, %v960_v12, %v962_v1  ;;  %v2667_v32 = vsel %vm665_vm0, %v1010_v59, %v1012_v24  ;;  %v3395_v61 = vmov %v3394_v47 }
 0x122   :  { %v2672_v4 = vmul.f32 %v3395_v61, %v2562_v9  ;;  %v2676_v57 = vsel %vm718_vm2, %v1060_v8, %v1062_v29  ;;  %v1064_v44 = vsel %vm718_vm2, %v1062_v29, %v1060_v8  ;;  %v779_v1 = vadd.f32 %v777_v34, %v2496_v2 }
 0x123   :  { %v2683_v12 = vsel %vm616_vm14, %v964_v21, 0.0  ;;  %v2687_v24 = vsel %vm669_vm1, %v1014_v3, 0.0  ;;  %v2691_v59 = vsel %vm722_vm3, %v1064_v44, 0.0  ;;  %v780_v11 = vadd.f32 %v778_v41, %v2502_v60 }
 0x124   :  { %v829_v19 = vadd.f32 %v827_v43, %v779_v1  ;;  %v3397_v14 = vstv %s1852_s15  ;;  %v3398_v34 = vstv %s1860_s18  ;;  %v3400_v39 = vstv %s1880_s24  ;;  %s1421_s15 = smov 3   ;;  %s1422_s18 = smov 2  }
 0x125   :  { %v877_v2 = vmul.f32 %v3397_v14, %v2659_v25  ;;  %v969_v35 = vmul.f32 %v3398_v34, %v2663_v45  ;;  %v1019_v42 = vmul.f32 %v3400_v39, %v2667_v32  ;;  %v3401_v29 = vstv %s3178_s5  ;;  %s3441_s24 = sld [smem:[#allocation85_spill]]  ;;  %s3442_s5 = sld [smem:[#allocation86_spill]] }
 0x126   :  { %v1069_v8 = vmul.f32 %v3401_v29, %v2676_v57  ;;  %v830_v20 = vadd.f32 %v828_v36, %v780_v11  ;;  %v3402_v63 = vmov %v3397_v14  ;;  %v785_v41 = vadd.f32 %v783_v23, %v2498_v10  ;;  %v3408_v23 = vld [vmem:[#allocation87_spill] sm:$0xff] }
 0x127   :  { %v878_v60 = vmul.f32 %v3402_v63, %v2611_v13  ;;  %v879_v43 = vadd.f32 %v877_v2, %v829_v19  ;;  %v3403_v21 = vmov %v3398_v34  ;;  %v3404_v47 = vmov %v3400_v39 }
 0x128   :  { %v970_v3 = vmul.f32 %v3403_v21, %v2683_v12  ;;  %v1020_v61 = vmul.f32 %v3404_v47, %v2687_v24  ;;  %v3405_v44 = vmov %v3401_v29  ;;  %v835_v36 = vadd.f32 %v833_v48, %v785_v41  ;;  %v3412_v48 = vld [vmem:[#allocation90_spill] sm:$0xff] }
 0x129   :  { %v1070_v1 = vmul.f32 %v3405_v44, %v2691_v59  ;;  %v880_v14 = vadd.f32 %v878_v60, %v830_v20  ;;  %v3407_v11 = vstv %s3396_s27  ;;  %v786_v10 = vadd.f32 %v2544_v17, %v2504_v27 }
 0x12a   :  { %v883_v34 = vmul.f32 %v3407_v11, %v2659_v25  ;;  %v921_v19 = vadd.f32 %v3408_v23, %v879_v43  ;;  %v3409_v2 = vstv %s3399_s22  ;;  %v3410_v29 = vstv %s3176_s4 }
 0x12b   :  { %v975_v39 = vmul.f32 %v3409_v2, %v2663_v45  ;;  %v1025_v63 = vmul.f32 %v3410_v29, %v2667_v32  ;;  %v3411_v21 = vmov %v3407_v11  ;;  %v922_v60 = vadd.f32 %v3412_v48, %v880_v14 }
 0x12c   :  { %v884_v20 = vmul.f32 %v3411_v21, %v2611_v13  ;;  %v885_v41 = vadd.f32 %v883_v34, %v835_v36  ;;  %v836_v47 = vadd.f32 %v834_v22, %v786_v10  ;;  %v791_v44 = vadd.f32 %v789_v6, %v2506_v56  ;;  %v3416_v21 = vld [vmem:[#allocation91_spill] sm:$0xff] }
 0x12d   :  { %v971_v27 = vadd.f32 %v969_v35, %v921_v19  ;;  %v3413_v17 = vstv %s3184_s11  ;;  %v3414_v11 = vmov %v3409_v2  ;;  %v3415_v2 = vstv %s3406_s17  ;;  %s3423_s11 = sld [smem:[#allocation50_spill]] }
 0x12e   :  { %v1075_v43 = vmul.f32 %v3413_v17, %v2676_v57  ;;  %v976_v23 = vmul.f32 %v3414_v11, %v2683_v12  ;;  %v889_v29 = vmul.f32 %v3415_v2, %v2659_v25  ;;  %v972_v53 = vadd.f32 %v970_v3, %v922_v60 }
 0x12f   :  { %v927_v5 = vadd.f32 %v3416_v21, %v885_v41  ;;  %v886_v14 = vadd.f32 %v884_v20, %v836_v47  ;;  %v841_v36 = vadd.f32 %v839_v46, %v791_v44  ;;  %v1021_v22 = vadd.f32 %v1019_v42, %v971_v27 }
 0x130   :  { %v3417_v56 = vstv %s3176_s4  ;;  %v3418_v35 = vmov %v3413_v17  ;;  %v792_v10 = vadd.f32 %v2554_v16, %v2522_v54  ;;  %v1022_v19 = vadd.f32 %v1020_v61, %v972_v53  ;;  %v3419_v17 = vld [vmem:[#allocation93_spill] sm:$0xff]  ;;  %v3422_v16 = vld [vmem:[#allocation94_spill] sm:$0xff]  ;;  %s3446_s4 = sld [smem:[#allocation63_spill]] }
 0x131   :  { %v1026_v6 = vmul.f32 %v3417_v56, %v2687_v24  ;;  %v1076_v34 = vmul.f32 %v3418_v35, %v2691_v59  ;;  %v977_v48 = vadd.f32 %v975_v39, %v927_v5  ;;  %v928_v3 = vadd.f32 %v3419_v17, %v886_v14 }
 0x132   :  { %v891_v60 = vadd.f32 %v889_v29, %v841_v36  ;;  %v1071_v41 = vadd.f32 %v1069_v8, %v1021_v22  ;;  %v3420_v46 = vstv %s3180_s23  ;;  %v842_v20 = vadd.f32 %v2622_v18, %v792_v10  ;;  %v3428_v22 = vld [vmem:[#allocation95_spill] sm:$0xff]  ;;  %s3433_s23 = sld [smem:[#allocation59_spill]] }
 0x133   :  { %v981_v42 = vmul.f32 %v3420_v46, %v2663_v45  ;;  %v3421_v47 = vmov %v3415_v2  ;;  %v1072_v27 = vadd.f32 %v1070_v1, %v1022_v19  ;;  %v1027_v11 = vadd.f32 %v1025_v63, %v977_v48 }
 0x134   :  { %v890_v44 = vmul.f32 %v3421_v47, %v2611_v13  ;;  %v978_v54 = vadd.f32 %v976_v23, %v928_v3  ;;  %v933_v53 = vadd.f32 %v3422_v16, %v891_v60  ;;  %1109 = vrot.lane.b32.xlu0 %v1071_v41, %s1421_s15  ;;  %v3424_v5 = vstv %s1938_s10  ;;  %s3432_s10 = sld [smem:[#allocation84_spill]] }
 0x135   :  { %v1031_v8 = vmul.f32 %v3424_v5, %v2667_v32  ;;  %v3425_v61 = vstv %s1958_s25  ;;  %v803_v2 = vadd.f32 %v2572_v40, %v2510_v30  ;;  %1111 = vrot.lane.b32.xlu1 %v1072_v27, %s1421_s15  ;;  %v3426_v23 = vmov %v3420_v46  ;;  %s1423_s25 = smov 1  }
 0x136   :  { %v1081_v39 = vmul.f32 %v3425_v61, %v2676_v57  ;;  %v892_v18 = vadd.f32 %v890_v44, %v842_v20  ;;  %v1028_v1 = vadd.f32 %v1026_v6, %v978_v54  ;;  %v983_v63 = vadd.f32 %v981_v42, %v933_v53  ;;  %v3437_v44 = vld [vmem:[#allocation96_spill] sm:$0xff] }
 0x137   :  { %v982_v29 = vmul.f32 %v3426_v23, %v2683_v12  ;;  %v3427_v21 = vmov %v3424_v5  ;;  %v1077_v36 = vadd.f32 %v1075_v43, %v1027_v11  ;;  %v853_v35 = vadd.f32 %v2641_v51, %v803_v2 }
 0x138   :  { %v1032_v14 = vmul.f32 %v3427_v21, %v2687_v24  ;;  %v934_v56 = vadd.f32 %v3428_v22, %v892_v18  ;;  %v3429_v10 = vstv %s3182_s26  ;;  %v3430_v40 = vstv %s3423_s11  ;;  %s3448_s26 = sld [smem:[#allocation75_spill]] }
 0x139   :  { %v901_v30 = vmul.f32 %v3429_v10, %v2659_v25  ;;  %v863_v6 = vmul.f32 %v3430_v40, %v2580_v62  ;;  %v1078_v19 = vadd.f32 %v1076_v34, %v1028_v1  ;;  %v1033_v48 = vadd.f32 %v1031_v8, %v983_v63  ;;  %1122 = vrot.lane.b32.xlu0 %v1077_v36, %s1422_s18  ;;  %v3444_v1 = vld [vmem:[#allocation97_spill] sm:$0xff] }
 0x13a   :  { %v804_v17 = vadd.f32 %v2576_v52, %v2530_v37  ;;  %v3431_v3 = vmov %v3430_v40  ;;  %v984_v51 = vadd.f32 %v982_v29, %v934_v56  ;;  %v3434_v60 = vmov %v3425_v61 }
 0x13b   :  { %v864_v43 = vmul.f32 %v3431_v3, %v2562_v9  ;;  %v1082_v41 = vmul.f32 %v3434_v60, %v2691_v59  ;;  %v903_v46 = vadd.f32 %v901_v30, %v853_v35  ;;  %1124 = vrot.lane.b32.xlu1 %v1078_v19, %s1422_s18  ;;  %v3435_v62 = vstv %s1940_s6  ;;  %s2843_s6 = sld [smem:[#allocation4 + $0x5e]] }
 0x13c   :  { %v993_v34 = vmul.f32 %v3435_v62, %v2663_v45  ;;  %v854_v42 = vadd.f32 %v2646_v31, %v804_v17  ;;  %v3436_v37 = vmov %v3429_v10  ;;  %v809_v9 = vadd.f32 %v2584_v0, %v2524_v38  ;;  %v3450_v10 = vld [vmem:[#allocation98_spill] sm:$0xff] }
 0x13d   :  { %v902_v52 = vmul.f32 %v3436_v37, %v2611_v13  ;;  %v1083_v20 = vadd.f32 %v1081_v39, %v1033_v48  ;;  %v1034_v47 = vadd.f32 %v1032_v14, %v984_v51  ;;  %v945_v27 = vadd.f32 %v3437_v44, %v903_v46 }
 0x13e   :  { %v3438_v11 = vstv %s1960_s3  ;;  %v3439_v16 = vstv %s3432_s10  ;;  %v859_v31 = vadd.f32 %v2655_v7, %v809_v9  ;;  %v3440_v8 = vstv %s3433_s23  ;;  %s2841_s3 = sld [smem:[#allocation4 + $0x57]] }
 0x13f   :  { %v1043_v54 = vmul.f32 %v3438_v11, %v2667_v32  ;;  %v1093_v53 = vmul.f32 %v3439_v16, %v2676_v57  ;;  %v904_v5 = vadd.f32 %v902_v52, %v854_v42  ;;  %v907_v61 = vmul.f32 %v3440_v8, %v2659_v25  ;;  %1135 = vrot.lane.b32.xlu0 %v1083_v20, %s1423_s25 }
 0x140   :  { %v1084_v38 = vadd.f32 %v1082_v41, %v1034_v47  ;;  %v995_v0 = vadd.f32 %v993_v34, %v945_v27  ;;  %v3443_v39 = vmov %v3435_v62  ;;  %v810_v2 = vadd.f32 %v2588_v58, %v2532_v15 }
 0x141   :  { %v994_v18 = vmul.f32 %v3443_v39, %v2683_v12  ;;  %v946_v63 = vadd.f32 %v3444_v1, %v904_v5  ;;  %v3445_v23 = vmov %v3438_v11  ;;  %v3447_v29 = vmov %v3439_v16  ;;  %v3465_v5 = vld [vmem:[#allocation100_spill] sm:$0xff] }
 0x142   :  { %v1044_v7 = vmul.f32 %v3445_v23, %v2687_v24  ;;  %v1094_v21 = vmul.f32 %v3447_v29, %v2691_v59  ;;  %v909_v14 = vadd.f32 %v907_v61, %v859_v31  ;;  %1137 = vrot.lane.b32.xlu1 %v1084_v38, %s1423_s25  ;;  %v1045_v36 = vadd.f32 %v1043_v54, %v995_v0 }
 0x143   :  { %v860_v22 = vadd.f32 %v2672_v4, %v810_v2  ;;  %v3449_v56 = vmov %v3440_v8  ;;  %v815_v15 = vadd.f32 %v2592_v28, %v2538_v26  ;;  %v996_v58 = vadd.f32 %v994_v18, %v946_v63  ;;  %v3468_v18 = vld [vmem:[#allocation13_spill] sm:$0xff] }
 0x144   :  { %v908_v35 = vmul.f32 %v3449_v56, %v2611_v13  ;;  %v951_v30 = vadd.f32 %v3450_v10, %v909_v14  ;;  %v3451_v40 = vstv %s3441_s24  ;;  %v3452_v48 = vstv %s3442_s5 }
 0x145   :  { %v999_v19 = vmul.f32 %v3451_v40, %v2663_v45  ;;  %v1049_v17 = vmul.f32 %v3452_v48, %v2667_v32  ;;  %v1095_v3 = vadd.f32 %v1093_v53, %v1045_v36  ;;  %v865_v4 = vadd.f32 %v863_v6, %v815_v15  ;;  %v3457_v6 = vld [vmem:[#allocation99_spill] sm:$0xff] }
 0x146   :  { %v910_v51 = vadd.f32 %v908_v35, %v860_v22  ;;  %v3453_v60 = vstv %s3446_s4  ;;  %v1046_v26 = vadd.f32 %v1044_v7, %v996_v58  ;;  %v3454_v46 = vstv %s3448_s26  ;;  %v3474_v22 = vld [vmem:[#allocation101_spill] sm:$0xff] }
 0x147   :  { %v913_v41 = vmul.f32 %v3453_v60, %v2659_v25  ;;  %v1001_v28 = vadd.f32 %v999_v19, %v951_v30  ;;  %v1099_v62 = vmul.f32 %v3454_v46, %v2676_v57  ;;  %v816_v34 = vadd.f32 %v2599_v33, %v2548_v50  ;;  %1150 = vrot.lane.b32.xlu0 %v1095_v3, %s1424_s1 }
 0x148   :  { %v952_v42 = vadd.f32 %v3457_v6, %v910_v51  ;;  %v3458_v37 = vmov %v3451_v40  ;;  %v3460_v9 = vmov %v3452_v48  ;;  %v1096_v44 = vadd.f32 %v1094_v21, %v1046_v26  ;;  %v3480_v6 = vld [vmem:[#allocation102_spill] sm:$0xff] }
 0x149   :  { %v1000_v52 = vmul.f32 %v3458_v37, %v2683_v12  ;;  %v1050_v20 = vmul.f32 %v3460_v9, %v2687_v24  ;;  %v915_v47 = vadd.f32 %v913_v41, %v865_v4  ;;  %v1051_v27 = vadd.f32 %v1049_v17, %v1001_v28 }
 0x14a   :  { %v866_v11 = vadd.f32 %v864_v43, %v816_v34  ;;  %v3463_v50 = vmov %v3453_v60  ;;  %v3464_v16 = vmov %v3454_v46  ;;  %v3466_v8 = vstv %s3455_s12  ;;  %1152 = vrot.lane.b32.xlu1 %v1096_v44, %s1424_s1 }
 0x14b   :  { %v914_v33 = vmul.f32 %v3463_v50, %v2611_v13  ;;  %v1002_v54 = vadd.f32 %v1000_v52, %v952_v42  ;;  %v1100_v53 = vmul.f32 %v3464_v16, %v2691_v59  ;;  %v957_v31 = vadd.f32 %v3465_v5, %v915_v47 }
 0x14c   :  { %v1005_v61 = vmul.f32 %v3466_v8, %v2663_v45  ;;  %v3467_v38 = vstv %s3456_s30  ;;  %v1101_v43 = vadd.f32 %v1099_v62, %v1051_v27  ;;  %v3469_v2 = vstv %s3459_s28 }
 0x14d   :  { %v896_v0 = vmul.f32 %v3467_v38, %v2611_v13  ;;  %v916_v39 = vadd.f32 %v914_v33, %v866_v11  ;;  %v937_v1 = vmul.f32 %v3469_v2, %v3468_v18  ;;  %v1052_v63 = vadd.f32 %v1050_v20, %v1002_v54  ;;  %v3481_v33 = vld [vmem:[#allocation64_spill] sm:$0xff]  ;;  %v3482_v54 = vld [vmem:[#allocation60_spill] sm:$0xff] }
 0x14e   :  { %v1007_v23 = vadd.f32 %v1005_v61, %v957_v31  ;;  %v3470_v7 = vstv %s3461_s19  ;;  %v3471_v21 = vstv %s3462_s16  ;;  %v3472_v36 = vmov %v3467_v38  ;;  %1163 = vrot.lane.b32.xlu0 %v1101_v43, %s1425_s2 }
 0x14f   :  { %v1055_v29 = vmul.f32 %v3470_v7, %v2667_v32  ;;  %v1105_v14 = vmul.f32 %v3471_v21, %v2676_v57  ;;  %v895_v13 = vmul.f32 %v3472_v36, %v2659_v25  ;;  %v958_v56 = vadd.f32 %v3474_v22, %v916_v39 }
 0x150   :  { %v3475_v35 = vmov %v3466_v8  ;;  %v3476_v58 = vmov %v3470_v7  ;;  %v1102_v30 = vadd.f32 %v1100_v53, %v1052_v63  ;;  %v1036_v19 = vstv %s2841_s3 }
 0x151   :  { %v1006_v15 = vmul.f32 %v3475_v35, %v2683_v12  ;;  %v1056_v10 = vmul.f32 %v3476_v58, %v2687_v24  ;;  %v1057_v40 = vadd.f32 %v1055_v29, %v1007_v23  ;;  %v1086_v48 = vstv %s2843_s6 }
 0x152   :  { %v3477_v3 = vmov %v3471_v21  ;;  %v897_v51 = vadd.f32 %v895_v13, %v2624_v55  ;;  %v898_v4 = vadd.f32 %v896_v0, %v2632_v49  ;;  %1165 = vrot.lane.b32.xlu1 %v1102_v30, %s1425_s2  ;;  %v3478_v41 = vstv %s3473_s20 }
 0x153   :  { %v1008_v17 = vadd.f32 %v1006_v15, %v958_v56  ;;  %v1106_v25 = vmul.f32 %v3477_v3, %v2691_v59  ;;  %v1107_v60 = vadd.f32 %v1105_v14, %v1057_v40  ;;  %v987_v26 = vmul.f32 %v3478_v41, %v2663_v45 }
 0x154   :  { %v3479_v28 = vmov %v3478_v41  ;;  %v939_v34 = vadd.f32 %v937_v1, %v897_v51  ;;  %v940_v42 = vadd.f32 %v3480_v6, %v898_v4  ;;  %v1038_v37 = vmul.f32 %v1036_v19, %v2687_v24 }
 0x155   :  { %v988_v46 = vmul.f32 %v3479_v28, %v2683_v12  ;;  %v1058_v62 = vadd.f32 %v1056_v10, %v1008_v17  ;;  %1176 = vrot.lane.b32.xlu0 %v1107_v60, %s1426_s21  ;;  %v1037_v55 = vmul.f32 %v1036_v19, %v2667_v32  ;;  %v1087_v49 = vmul.f32 %v1086_v48, %v2676_v57 }
 0x156   :  { %v989_v9 = vadd.f32 %v987_v26, %v939_v34  ;;  %v1088_v45 = vmul.f32 %v1086_v48, %v2691_v59  ;;  %v2908_v24 = vand.u32 15, %v3481_v33  ;;  %vm1126_vm4 = vcmp.lt.s32.totalorder %v3482_v54, 2 }
 0x157   :  { %v1108_v52 = vadd.f32 %v1106_v25, %v1058_v62  ;;  %v990_v20 = vadd.f32 %v988_v46, %v940_v42  ;;  %vm1113_vm5 = vcmp.lt.s32.totalorder %v3482_v54, 3  ;;  %v401_v59 = vand.u32 15, %v3482_v54 }
 0x158   :  { %v1039_v47 = vadd.f32 %v1037_v55, %v989_v9  ;;  %vm1130_vm6 = vcmp.ge.s32.totalorder %v2908_v24, 2  ;;  %vm1117_vm7 = vcmp.ge.s32.totalorder %v2908_v24, 3  ;;  %vm1139_vm8 = vcmp.lt.s32.totalorder %v3482_v54, 1 }
 0x159   :  { %1178 = vrot.lane.b32.xlu1 %v1108_v52, %s1426_s21  ;;  %v1040_v12 = vadd.f32 %v1038_v37, %v990_v20  ;;  %vm1143_vm9 = vcmp.ge.s32.totalorder %v2908_v24, 1  ;;  %vm1129_vm10 = vcmp.ge.s32.totalorder %v401_v59, 2  ;;  %vm1116_vm11 = vcmp.ge.s32.totalorder %v401_v59, 3 }
 0x15a   :  { %v1089_v44 = vadd.f32 %v1087_v49, %v1039_v47  ;;  %vm1142_vm12 = vcmp.ge.s32.totalorder %v401_v59, 1  ;;  %vm1154_vm13 = vcmp.lt.s32.totalorder %v3482_v54, 127  ;;  %vm1158_vm14 = vcmp.lt.s32.totalorder %v2908_v24, 15 }
 0x15b   :  { %v1090_v27 = vadd.f32 %v1088_v45, %v1040_v12  ;;  %vm1157_vm15 = vcmp.lt.s32.totalorder %v401_v59, 15  ;;  %vm1167_vm0 = vcmp.lt.s32.totalorder %v3482_v54, 126  ;;  %vm1171_vm1 = vcmp.lt.s32.totalorder %v2908_v24, 14 }
 0x15c   :  { %vm1170_vm2 = vcmp.lt.s32.totalorder %v401_v59, 14  ;;  %vm1180_vm3 = vcmp.lt.s32.totalorder %v3482_v54, 125 }
 0x1a6   :  { %v1110_v11 = vpop.permute.xlu0 %1109 }
 0x1a7   :  { %v1112_v50 = vpop.permute.xlu1 %1111 }
 0x1a8   :  { %v1114_v53 = vsel %vm1113_vm5, %v1110_v11, %v1112_v50  ;;  %v1115_v39 = vsel %vm1113_vm5, %v1112_v50, %v1110_v11  ;;  %vm1184_vm5 = vcmp.lt.s32.totalorder %v2908_v24, 13 }
 0x1a9   :  { %v1119_v8 = vsel %vm1117_vm7, %v1114_v53, 0.0  ;;  %v1118_v7 = vsel %vm1116_vm11, %v1115_v39, 0.0 }
 0x1ab   :  { %v1123_v32 = vpop.permute.xlu0 %1122 }
 0x1ad   :  { %v1125_v57 = vpop.permute.xlu1 %1124 }
 0x1ae   :  { %v1127_v16 = vsel %vm1126_vm4, %v1123_v32, %v1125_v57  ;;  %v1128_v61 = vsel %vm1126_vm4, %v1125_v57, %v1123_v32  ;;  %vm1183_vm4 = vcmp.lt.s32.totalorder %v401_v59, 13 }
 0x1af   :  { %v1132_v5 = vsel %vm1130_vm6, %v1127_v16, 0.0  ;;  %v1131_v1 = vsel %vm1129_vm10, %v1128_v61, 0.0 }
 0x1b0   :  { %v1134_v0 = vadd.f32 %v1132_v5, %v1119_v8  ;;  %v1133_v14 = vadd.f32 %v1131_v1, %v1118_v7 }
 0x1b1   :  { %v1136_v31 = vpop.permute.xlu0 %1135 }
 0x1b4   :  { %v1138_v38 = vpop.permute.xlu1 %1137 }
 0x1b5   :  { %v1140_v43 = vsel %vm1139_vm8, %v1136_v31, %v1138_v38  ;;  %v1141_v18 = vsel %vm1139_vm8, %v1138_v38, %v1136_v31 }
 0x1b6   :  { %v1145_v2 = vsel %vm1143_vm9, %v1140_v43, 0.0  ;;  %v1144_v29 = vsel %vm1142_vm12, %v1141_v18, 0.0 }
 0x1b7   :  { %v1147_v63 = vadd.f32 %v1145_v2, %v1134_v0  ;;  %v1146_v13 = vadd.f32 %v1144_v29, %v1133_v14 }
 0x1b9   :  { %v1151_v23 = vpop.permute.xlu0 %1150  ;;  %v1149_v21 = vadd.f32 %v1147_v63, %v1090_v27  ;;  %v1148_v10 = vadd.f32 %v1146_v13, %v1089_v44 }
 0x1bc   :  { %v1153_v36 = vpop.permute.xlu1 %1152 }
 0x1bd   :  { %v1156_v22 = vsel %vm1154_vm13, %v1153_v36, %v1151_v23  ;;  %v1155_v15 = vsel %vm1154_vm13, %v1151_v23, %v1153_v36 }
 0x1be   :  { %v1160_v56 = vsel %vm1158_vm14, %v1156_v22, 0.0  ;;  %v1159_v40 = vsel %vm1157_vm15, %v1155_v15, 0.0 }
 0x1bf   :  { %v1162_v58 = vadd.f32 %v1160_v56, %v1149_v21  ;;  %v1161_v4 = vadd.f32 %v1159_v40, %v1148_v10 }
 0x1c0   :  { %v1164_v35 = vpop.permute.xlu0 %1163 }
 0x1c4   :  { %v1166_v30 = vpop.permute.xlu1 %1165 }
 0x1c5   :  { %v1168_v19 = vsel %vm1167_vm0, %v1164_v35, %v1166_v30  ;;  %v1169_v48 = vsel %vm1167_vm0, %v1166_v30, %v1164_v35 }
 0x1c6   :  { %v1173_v17 = vsel %vm1171_vm1, %v1169_v48, 0.0  ;;  %v1172_v3 = vsel %vm1170_vm2, %v1168_v19, 0.0 }
 0x1c7   :  { %v1175_v25 = vadd.f32 %v1173_v17, %v1162_v58  ;;  %v1177_v51 = vpop.permute.xlu0 %1176  ;;  %v1174_v41 = vadd.f32 %v1172_v3, %v1161_v4 }
 0x1cb   :  { %v1179_v60 = vpop.permute.xlu1 %1178 }
 0x1cc   :  { %v1181_v26 = vsel %vm1180_vm3, %v1177_v51, %v1179_v60  ;;  %v1182_v28 = vsel %vm1180_vm3, %v1179_v60, %v1177_v51 }
 0x1cd   :  { %v1185_v46 = vsel %vm1183_vm4, %v1181_v26, 0.0  ;;  %v1186_v62 = vsel %vm1184_vm5, %v1182_v28, 0.0 }
 0x1ce   :  { %v1187_v34 = vadd.f32 %v1185_v46, %v1174_v41  ;;  %v1188_v6 = vadd.f32 %v1186_v62, %v1175_v25 }
 0x1d0   :  { %v1316_v42 = vmul.f32 -1.442695, %v1187_v34  ;;  %v1317_v37 = vmul.f32 -1.442695, %v1188_v6 }
 0x1d2   :  { %1343 = vpow2.f32 %v1316_v42 }
 0x1d3   :  { %1345 = vpow2.f32 %v1317_v37 }
 0x1dc   :  { %v1344_v55 = vpop.eup %1343 }
 0x1dd   :  { %v1346_v49 = vpop.eup %1345  ;;  %v1195_v52 = vadd.f32 1.0, %v1344_v55 }
 0x1de   :  { %v1196_v9 = vadd.f32 1.0, %v1346_v49 }
 0x1df   :  { %1347 = vrcp.f32 %v1195_v52 }
 0x1e0   :  { %1349 = vrcp.f32 %v1196_v9 }
 0x1e9   :  { %v1348_v20 = vpop.eup %1347 }
 0x1ea   :  { %v1350_v45 = vpop.eup %1349  ;;  %1201 = vst [vmem:[#allocation9] sm:$0xff] %v1348_v20 }
 0x1eb   :  { %1202 = vst [vmem:[#allocation9 + $0x8] sm:$0xff] %v1350_v45 }
 0x1ec   :  { %1394 = shalt.err (!%p1391_p1)
}
 0x1ed   :  { %s3483_s7 = sld [smem:[#allocation125_spill]] }
 0x1f3   :  { %s1395_s8 = scalar_lea.hbm %s3483_s7, 256 }
 0x1f4   :  { %p1396_p2 = scmp.ne.s32.totalorder %s3483_s7, %s1395_s8  ;;  %p1399_p3 = scmp.lt.u32.totalorder %s1395_s8, %s3483_s7 }
 0x1f6   :  { %p1401_p4 = pnand %p1399_p3, %p1396_p2 }
 0x1f8   :  { %1404 = shalt.err (!%p1401_p4)
}
 0x1f9   :  { %1212 = dma.vmem_to_hbm [thread:$0]  %s1210_s29, 256, %s3483_s7, [#allocation6]  }
 0x1fa   :  { %1409 = dma.done.wait [#allocation6], 256  }
 0x1fb   :  { %1410 = vsyncadd [#allocation6], 4294967040 }
 0x1fc   :  { %1216 = vsyncpa [#allocation5], 1 }
 0x1fd   :  { %1217 = vsyncpa [#allocation6], 1 }
 0x1fe   :  { %1218 = vsyncpa [#allocation7], 1 }

</bundles_post_ra>
